<compile_context>
chip_gen: v6e
topology: v6e:2x2x1
jax: 0.10.0
libtpu: 0.0.40
codegen_flags: <defaults>
</compile_context>

<pallas_src>
import functools
import math

import jax
import jax.numpy as jnp
import numpy as np
from jax import lax
from jax.experimental import pallas as pl
from jax.experimental.pallas import tpu as pltpu

_LANES = 128
_MAX_TILE_ROWS = 512      # 512*128 px/tile (~0.75 MiB per f32 channel block)
_UNROLL_MAX_DOTS = 32     # Python-unroll below this; rolled fori_loop above


def _image_dot_kernel(alpha_ref, beta_ref, logc_ref, cy_ref, cx_ref, col_ref,
                      x_ref, o_ref, *, n_dots, width, tile_rows):
    # x_ref / o_ref: (1, 3, tile_rows, 128) VMEM tiles; all params are SMEM.
    shape = (tile_rows, _LANES)
    base = pl.program_id(1) * (tile_rows * _LANES)

    # Flat pixel index of this tile, exact in f32 (wrapper asserts H*W < 2^23).
    row_iota = lax.broadcasted_iota(jnp.int32, shape, 0)
    lane_iota = lax.broadcasted_iota(jnp.int32, shape, 1)
    idx_f = (base + row_iota * _LANES + lane_iota).astype(jnp.float32)

    # hv = idx // W, wv = idx % W via reciprocal multiply + floor, with an
    # off-by-one correction so the result is exact despite the rounded 1/W.
    # Per-tile (not per-dot) cost: amortized over the dot loop.
    inv_w = 1.0 / width                          # static Python constant
    q = jnp.floor(idx_f * inv_w)
    r = idx_f - q * width
    q = jnp.where(r < 0.0, q - 1.0, jnp.where(r >= width, q + 1.0, q))
    hv = q
    wv = idx_f - q * width

    # Three dense channel planes carried across the whole dot chain.
    ch = [x_ref[0, c].astype(jnp.float32) for c in range(3)]

    def one_dot(i, c0, c1, c2):
        dy = hv - cy_ref[i]
        dx = wv - cx_ref[i]
        r2 = dy * dy + dx * dx
        # (r2/r^2)^beta == exp(beta*log(r2) + beta*log(1/r^2)); the second term
        # is the hoisted per-dot scalar logc.  max() guards log(0) at an exact
        # integer dot center (both paths end up with mask ~= 1 there).
        t = beta_ref[i] * jnp.log(jnp.maximum(r2, 1e-30)) + logc_ref[i]
        at = alpha_ref[i] * jnp.exp(-jnp.exp(t))       # +1e-10 folded into alpha
        om = 1.0 - at
        c0 = om * c0 + at * col_ref[3 * i]
        c1 = om * c1 + at * col_ref[3 * i + 1]
        c2 = om * c2 + at * col_ref[3 * i + 2]
        return c0, c1, c2

    if n_dots <= _UNROLL_MAX_DOTS:
        # Small dot counts: Python-unrolled for best LLO scheduling.
        for i in range(n_dots):
            ch[0], ch[1], ch[2] = one_dot(i, ch[0], ch[1], ch[2])
    else:
        # Large dot counts: rolled loop with dynamic SMEM scalar indexing.
        ch = list(lax.fori_loop(0, n_dots, lambda i, c: one_dot(i, *c),
                                tuple(ch)))

    for c in range(3):               # full lane-dense, unmasked stores
        o_ref[0, c] = ch[c].astype(o_ref.dtype)


def image_dot_forward(x, alpha, radius, beta, center, color,
                      means=(0.485, 0.456, 0.406), stds=(0.229, 0.224, 0.225)):
    N, C, H, W = x.shape
    assert C == 3, "ImageDot operates on RGB images"
    # In-kernel f32 coordinate generation needs exact integer pixel indices.
    assert H * W <= (1 << 23), "image too large for f32 coord generation"
    n_dots = alpha.shape[0]

    # --- per-dot scalar preprocessing (plain JAX glue) ---
    alpha_eff = alpha.astype(jnp.float32) * (0.3 * math.exp(1e-10))
    beta_eff = beta.astype(jnp.float32) * 2.0
    r_eff = radius.astype(jnp.float32) * 25.0
    logc = -2.0 * beta_eff * jnp.log(r_eff)              # beta_eff*log(1/r^2)
    cy = center[:, 0].astype(jnp.float32) * (H - 1)
    cx = center[:, 1].astype(jnp.float32) * (W - 1)
    ncolor = ((color.astype(jnp.float32) - jnp.array(means, jnp.float32))
              / jnp.array(stds, jnp.float32)).reshape(-1)  # flat 1-D (3*n_dots,)

    # --- lane-dense pixel layout: (N,3,H,W) -> (N,3,rows_pad,128) ---
    itemsize = jnp.dtype(x.dtype).itemsize
    sub = max(8, 32 // itemsize)                 # sublane packing per dtype
    P = H * W
    rows = pl.cdiv(P, _LANES)
    tile_r = min(pl.cdiv(rows, sub) * sub, _MAX_TILE_ROWS)
    num_tiles = pl.cdiv(rows, tile_r)
    # v7x megacore: make sure the "parallel" grid has at least 2 steps.
    if N * num_tiles < 2 and tile_r > sub:
        tile_r = pl.cdiv(tile_r // 2, sub) * sub
        num_tiles = pl.cdiv(rows, tile_r)
    rows_pad = num_tiles * tile_r
    p_pad = rows_pad * _LANES

    xf = x.reshape(N, 3, P)
    if p_pad != P:
        xf = jnp.pad(xf, ((0, 0), (0, 0), (0, p_pad - P)))
    x4 = xf.reshape(N, 3, rows_pad, _LANES)

    kernel = functools.partial(_image_dot_kernel, n_dots=n_dots, width=W,
                               tile_rows=tile_r)
    smem = pl.BlockSpec(memory_space=pltpu.MemorySpace.SMEM)
    img_spec = pl.BlockSpec((1, 3, tile_r, _LANES), lambda b, t: (b, 0, t, 0))

    out4 = pl.pallas_call(
        kernel,
        out_shape=jax.ShapeDtypeStruct((N, 3, rows_pad, _LANES), x.dtype),
        grid=(N, num_tiles),
        in_specs=[smem, smem, smem, smem, smem, smem, img_spec],
        out_specs=img_spec,
        # In-place blend over the (padded) image buffer.  Note: holds
        # end-to-end only if the caller donates x; otherwise XLA copies.
        input_output_aliases={6: 0},
        compiler_params=pltpu.CompilerParams(
            dimension_semantics=("parallel", "parallel")),
    )(alpha_eff, beta_eff, logc, cy, cx, ncolor, x4)

    return out4.reshape(N, 3, p_pad)[:, :, :P].reshape(N, 3, H, W)


def image_dot_reference(x, alpha, radius, beta, center, color,
                        means=(0.485, 0.456, 0.406), stds=(0.229, 0.224, 0.225)):
    """Pure-JAX reference mirroring the PyTorch forward, for validation."""
    N, C, H, W = x.shape
    hv = jnp.arange(H, dtype=jnp.float32)[:, None] * jnp.ones((1, W), jnp.float32)
    wv = jnp.ones((H, 1), jnp.float32) * jnp.arange(W, dtype=jnp.float32)[None, :]
    blended = x.astype(jnp.float32)
    means = jnp.array(means, jnp.float32)
    stds = jnp.array(stds, jnp.float32)
    for i in range(center.shape[0]):
        cy = center[i, 0] * (H - 1)
        cx = center[i, 1] * (W - 1)
        b = beta[i] * 2.0
        r = radius[i] * 25.0
        a = alpha[i] * 0.3
        d = ((hv - cy) ** 2 + (wv - cx) ** 2) / (r ** 2)
        mask = jnp.exp(-(d ** b) + 1e-10)
        at = a * mask[None, None, :, :]                    # (1,1,H,W)
        col = (color[i] - means) / stds                    # (3,)
        color_tile = col[None, :, None, None] * jnp.ones_like(blended)
        blended = (1.0 - at) * blended + at * color_tile
    return blended.astype(x.dtype)


if __name__ == "__main__":
    key = jax.random.PRNGKey(0)
    N, C, H, W = 2, 3, 16, 16
    x = jax.random.uniform(key, (N, C, H, W), dtype=jnp.float32)

    # Deterministic parameters, exactly as in ImageDot.__init__.
    n_dots = 9
    alpha = jnp.ones((n_dots,), jnp.float32)
    radius = jnp.ones((n_dots,), jnp.float32)
    beta = jnp.ones((n_dots,), jnp.float32)
    center = jnp.array([[0.25, 0.25], [0.25, 0.50], [0.25, 0.75],
                        [0.50, 0.25], [0.50, 0.50], [0.50, 0.75],
                        [0.75, 0.25], [0.75, 0.50], [0.75, 0.75]], jnp.float32)
    color = jnp.full((n_dots, 3), 0.5, jnp.float32)

    out = image_dot_forward(x, alpha, radius, beta, center, color)
    out = jax.block_until_ready(out)

    ref = image_dot_reference(x, alpha, radius, beta, center, color)
    np.testing.assert_allclose(np.asarray(out), np.asarray(ref),
                               rtol=1e-4, atol=1e-4)

    print("KERNEL_OK")
</pallas_src>

<mosaic_0001>
module attributes {stable_mosaic.version = 11 : i64} {
  func.func @_image_dot_kernel(%arg0: i32, %arg1: i32, %arg2: memref<9xf32, #tpu.memory_space<smem>>, %arg3: memref<9xf32, #tpu.memory_space<smem>>, %arg4: memref<9xf32, #tpu.memory_space<smem>>, %arg5: memref<9xf32, #tpu.memory_space<smem>>, %arg6: memref<9xf32, #tpu.memory_space<smem>>, %arg7: memref<27xf32, #tpu.memory_space<smem>>, %arg8: memref<1x3x8x128xf32, #tpu.memory_space<vmem>>, %arg9: memref<1x3x8x128xf32, #tpu.memory_space<vmem>>) attributes {dimension_semantics = [#tpu.dimension_semantics<parallel>, #tpu.dimension_semantics<parallel>], iteration_bounds = array<i64: 2, 1>, scalar_prefetch = 0 : i64, scratch_operands = 0 : i64, tpu.core_type = #tpu.core_type<tc>, window_params = [{transform_indices = @transform_0, window_bounds = array<i64: 9>}, {transform_indices = @transform_1, window_bounds = array<i64: 9>}, {transform_indices = @transform_2, window_bounds = array<i64: 9>}, {transform_indices = @transform_3, window_bounds = array<i64: 9>}, {transform_indices = @transform_4, window_bounds = array<i64: 9>}, {transform_indices = @transform_5, window_bounds = array<i64: 27>}, {transform_indices = @transform_6, window_bounds = array<i64: 1, 3, 8, 128>}, {transform_indices = @transform_7, window_bounds = array<i64: 1, 3, 8, 128>}]} {
    %c1024_i32 = arith.constant 1024 : i32
    %0 = arith.muli %arg1, %c1024_i32 : i32
    %1 = tpu.iota {dimensions = array<i32: 0>} : vector<8x128xi32>
    %2 = tpu.iota {dimensions = array<i32: 1>} : vector<8x128xi32>
    %c128_i32 = arith.constant 128 : i32
    %3 = vector.broadcast %c128_i32 : i32 to vector<8x128xi32>
    %4 = arith.muli %1, %3 : vector<8x128xi32>
    %5 = vector.broadcast %0 : i32 to vector<8x128xi32>
    %6 = arith.addi %5, %4 : vector<8x128xi32>
    %7 = arith.addi %6, %2 : vector<8x128xi32>
    %8 = arith.sitofp %7 : vector<8x128xi32> to vector<8x128xf32>
    %cst = arith.constant 6.250000e-02 : f32
    %9 = vector.broadcast %cst : f32 to vector<8x128xf32>
    %10 = arith.mulf %8, %9 : vector<8x128xf32>
    %11 = math.floor %10 : vector<8x128xf32>
    %cst_0 = arith.constant 1.600000e+01 : f32
    %12 = vector.broadcast %cst_0 : f32 to vector<8x128xf32>
    %13 = arith.mulf %11, %12 : vector<8x128xf32>
    %14 = arith.subf %8, %13 : vector<8x128xf32>
    %cst_1 = arith.constant 0.000000e+00 : f32
    %15 = vector.broadcast %cst_1 : f32 to vector<8x128xf32>
    %16 = arith.cmpf olt, %14, %15 : vector<8x128xf32>
    %cst_2 = arith.constant 1.000000e+00 : f32
    %17 = vector.broadcast %cst_2 : f32 to vector<8x128xf32>
    %18 = arith.subf %11, %17 : vector<8x128xf32>
    %cst_3 = arith.constant 1.600000e+01 : f32
    %19 = vector.broadcast %cst_3 : f32 to vector<8x128xf32>
    %20 = arith.cmpf oge, %14, %19 : vector<8x128xf32>
    %cst_4 = arith.constant 1.000000e+00 : f32
    %21 = vector.broadcast %cst_4 : f32 to vector<8x128xf32>
    %22 = arith.addf %11, %21 : vector<8x128xf32>
    %23 = arith.select %20, %22, %11 : vector<8x128xi1>, vector<8x128xf32>
    %24 = arith.select %16, %18, %23 : vector<8x128xi1>, vector<8x128xf32>
    %cst_5 = arith.constant 1.600000e+01 : f32
    %25 = vector.broadcast %cst_5 : f32 to vector<8x128xf32>
    %26 = arith.mulf %24, %25 : vector<8x128xf32>
    %27 = arith.subf %8, %26 : vector<8x128xf32>
    %c0 = arith.constant 0 : index
    %c0_6 = arith.constant 0 : index
    %c0_7 = arith.constant 0 : index
    %c0_8 = arith.constant 0 : index
    %28 = vector.load %arg8[%c0, %c0_6, %c0_7, %c0_8] : memref<1x3x8x128xf32, #tpu.memory_space<vmem>>, vector<1x1x8x128xf32>
    %29 = vector.shape_cast %28 : vector<1x1x8x128xf32> to vector<8x128xf32>
    %c0_9 = arith.constant 0 : index
    %c1 = arith.constant 1 : index
    %c0_10 = arith.constant 0 : index
    %c0_11 = arith.constant 0 : index
    %30 = vector.load %arg8[%c0_9, %c1, %c0_10, %c0_11] : memref<1x3x8x128xf32, #tpu.memory_space<vmem>>, vector<1x1x8x128xf32>
    %31 = vector.shape_cast %30 : vector<1x1x8x128xf32> to vector<8x128xf32>
    %c0_12 = arith.constant 0 : index
    %c2 = arith.constant 2 : index
    %c0_13 = arith.constant 0 : index
    %c0_14 = arith.constant 0 : index
    %32 = vector.load %arg8[%c0_12, %c2, %c0_13, %c0_14] : memref<1x3x8x128xf32, #tpu.memory_space<vmem>>, vector<1x1x8x128xf32>
    %33 = vector.shape_cast %32 : vector<1x1x8x128xf32> to vector<8x128xf32>
    %c0_15 = arith.constant 0 : index
    %34 = memref.load %arg5[%c0_15] : memref<9xf32, #tpu.memory_space<smem>>
    %35 = vector.broadcast %34 : f32 to vector<8x128xf32>
    %36 = arith.subf %24, %35 : vector<8x128xf32>
    %c0_16 = arith.constant 0 : index
    %37 = memref.load %arg6[%c0_16] : memref<9xf32, #tpu.memory_space<smem>>
    %38 = vector.broadcast %37 : f32 to vector<8x128xf32>
    %39 = arith.subf %27, %38 : vector<8x128xf32>
    %40 = arith.mulf %36, %36 : vector<8x128xf32>
    %41 = arith.mulf %39, %39 : vector<8x128xf32>
    %42 = arith.addf %40, %41 : vector<8x128xf32>
    %c0_17 = arith.constant 0 : index
    %43 = memref.load %arg3[%c0_17] : memref<9xf32, #tpu.memory_space<smem>>
    %cst_18 = arith.constant 1.000000e-30 : f32
    %44 = vector.broadcast %cst_18 : f32 to vector<8x128xf32>
    %45 = arith.maximumf %42, %44 : vector<8x128xf32>
    %46 = math.log %45 : vector<8x128xf32>
    %47 = vector.broadcast %43 : f32 to vector<8x128xf32>
    %48 = arith.mulf %47, %46 : vector<8x128xf32>
    %c0_19 = arith.constant 0 : index
    %49 = memref.load %arg4[%c0_19] : memref<9xf32, #tpu.memory_space<smem>>
    %50 = vector.broadcast %49 : f32 to vector<8x128xf32>
    %51 = arith.addf %48, %50 : vector<8x128xf32>
    %c0_20 = arith.constant 0 : index
    %52 = memref.load %arg2[%c0_20] : memref<9xf32, #tpu.memory_space<smem>>
    %53 = math.exp %51 : vector<8x128xf32>
    %cst_21 = arith.constant 0.000000e+00 : f32
    %54 = vector.broadcast %cst_21 : f32 to vector<8x128xf32>
    %55 = arith.subf %54, %53 : vector<8x128xf32>
    %56 = math.exp %55 : vector<8x128xf32>
    %57 = vector.broadcast %52 : f32 to vector<8x128xf32>
    %58 = arith.mulf %57, %56 : vector<8x128xf32>
    %cst_22 = arith.constant 1.000000e+00 : f32
    %59 = vector.broadcast %cst_22 : f32 to vector<8x128xf32>
    %60 = arith.subf %59, %58 : vector<8x128xf32>
    %61 = arith.mulf %60, %29 : vector<8x128xf32>
    %c0_23 = arith.constant 0 : index
    %62 = memref.load %arg7[%c0_23] : memref<27xf32, #tpu.memory_space<smem>>
    %63 = vector.broadcast %62 : f32 to vector<8x128xf32>
    %64 = arith.mulf %58, %63 : vector<8x128xf32>
    %65 = arith.addf %61, %64 : vector<8x128xf32>
    %66 = arith.mulf %60, %31 : vector<8x128xf32>
    %c1_24 = arith.constant 1 : index
    %67 = memref.load %arg7[%c1_24] : memref<27xf32, #tpu.memory_space<smem>>
    %68 = vector.broadcast %67 : f32 to vector<8x128xf32>
    %69 = arith.mulf %58, %68 : vector<8x128xf32>
    %70 = arith.addf %66, %69 : vector<8x128xf32>
    %71 = arith.mulf %60, %33 : vector<8x128xf32>
    %c2_25 = arith.constant 2 : index
    %72 = memref.load %arg7[%c2_25] : memref<27xf32, #tpu.memory_space<smem>>
    %73 = vector.broadcast %72 : f32 to vector<8x128xf32>
    %74 = arith.mulf %58, %73 : vector<8x128xf32>
    %75 = arith.addf %71, %74 : vector<8x128xf32>
    %c1_26 = arith.constant 1 : index
    %76 = memref.load %arg5[%c1_26] : memref<9xf32, #tpu.memory_space<smem>>
    %77 = vector.broadcast %76 : f32 to vector<8x128xf32>
    %78 = arith.subf %24, %77 : vector<8x128xf32>
    %c1_27 = arith.constant 1 : index
    %79 = memref.load %arg6[%c1_27] : memref<9xf32, #tpu.memory_space<smem>>
    %80 = vector.broadcast %79 : f32 to vector<8x128xf32>
    %81 = arith.subf %27, %80 : vector<8x128xf32>
    %82 = arith.mulf %78, %78 : vector<8x128xf32>
    %83 = arith.mulf %81, %81 : vector<8x128xf32>
    %84 = arith.addf %82, %83 : vector<8x128xf32>
    %c1_28 = arith.constant 1 : index
    %85 = memref.load %arg3[%c1_28] : memref<9xf32, #tpu.memory_space<smem>>
    %cst_29 = arith.constant 1.000000e-30 : f32
    %86 = vector.broadcast %cst_29 : f32 to vector<8x128xf32>
    %87 = arith.maximumf %84, %86 : vector<8x128xf32>
    %88 = math.log %87 : vector<8x128xf32>
    %89 = vector.broadcast %85 : f32 to vector<8x128xf32>
    %90 = arith.mulf %89, %88 : vector<8x128xf32>
    %c1_30 = arith.constant 1 : index
    %91 = memref.load %arg4[%c1_30] : memref<9xf32, #tpu.memory_space<smem>>
    %92 = vector.broadcast %91 : f32 to vector<8x128xf32>
    %93 = arith.addf %90, %92 : vector<8x128xf32>
    %c1_31 = arith.constant 1 : index
    %94 = memref.load %arg2[%c1_31] : memref<9xf32, #tpu.memory_space<smem>>
    %95 = math.exp %93 : vector<8x128xf32>
    %cst_32 = arith.constant 0.000000e+00 : f32
    %96 = vector.broadcast %cst_32 : f32 to vector<8x128xf32>
    %97 = arith.subf %96, %95 : vector<8x128xf32>
    %98 = math.exp %97 : vector<8x128xf32>
    %99 = vector.broadcast %94 : f32 to vector<8x128xf32>
    %100 = arith.mulf %99, %98 : vector<8x128xf32>
    %cst_33 = arith.constant 1.000000e+00 : f32
    %101 = vector.broadcast %cst_33 : f32 to vector<8x128xf32>
    %102 = arith.subf %101, %100 : vector<8x128xf32>
    %103 = arith.mulf %102, %65 : vector<8x128xf32>
    %c3 = arith.constant 3 : index
    %104 = memref.load %arg7[%c3] : memref<27xf32, #tpu.memory_space<smem>>
    %105 = vector.broadcast %104 : f32 to vector<8x128xf32>
    %106 = arith.mulf %100, %105 : vector<8x128xf32>
    %107 = arith.addf %103, %106 : vector<8x128xf32>
    %108 = arith.mulf %102, %70 : vector<8x128xf32>
    %c4 = arith.constant 4 : index
    %109 = memref.load %arg7[%c4] : memref<27xf32, #tpu.memory_space<smem>>
    %110 = vector.broadcast %109 : f32 to vector<8x128xf32>
    %111 = arith.mulf %100, %110 : vector<8x128xf32>
    %112 = arith.addf %108, %111 : vector<8x128xf32>
    %113 = arith.mulf %102, %75 : vector<8x128xf32>
    %c5 = arith.constant 5 : index
    %114 = memref.load %arg7[%c5] : memref<27xf32, #tpu.memory_space<smem>>
    %115 = vector.broadcast %114 : f32 to vector<8x128xf32>
    %116 = arith.mulf %100, %115 : vector<8x128xf32>
    %117 = arith.addf %113, %116 : vector<8x128xf32>
    %c2_34 = arith.constant 2 : index
    %118 = memref.load %arg5[%c2_34] : memref<9xf32, #tpu.memory_space<smem>>
    %119 = vector.broadcast %118 : f32 to vector<8x128xf32>
    %120 = arith.subf %24, %119 : vector<8x128xf32>
    %c2_35 = arith.constant 2 : index
    %121 = memref.load %arg6[%c2_35] : memref<9xf32, #tpu.memory_space<smem>>
    %122 = vector.broadcast %121 : f32 to vector<8x128xf32>
    %123 = arith.subf %27, %122 : vector<8x128xf32>
    %124 = arith.mulf %120, %120 : vector<8x128xf32>
    %125 = arith.mulf %123, %123 : vector<8x128xf32>
    %126 = arith.addf %124, %125 : vector<8x128xf32>
    %c2_36 = arith.constant 2 : index
    %127 = memref.load %arg3[%c2_36] : memref<9xf32, #tpu.memory_space<smem>>
    %cst_37 = arith.constant 1.000000e-30 : f32
    %128 = vector.broadcast %cst_37 : f32 to vector<8x128xf32>
    %129 = arith.maximumf %126, %128 : vector<8x128xf32>
    %130 = math.log %129 : vector<8x128xf32>
    %131 = vector.broadcast %127 : f32 to vector<8x128xf32>
    %132 = arith.mulf %131, %130 : vector<8x128xf32>
    %c2_38 = arith.constant 2 : index
    %133 = memref.load %arg4[%c2_38] : memref<9xf32, #tpu.memory_space<smem>>
    %134 = vector.broadcast %133 : f32 to vector<8x128xf32>
    %135 = arith.addf %132, %134 : vector<8x128xf32>
    %c2_39 = arith.constant 2 : index
    %136 = memref.load %arg2[%c2_39] : memref<9xf32, #tpu.memory_space<smem>>
    %137 = math.exp %135 : vector<8x128xf32>
    %cst_40 = arith.constant 0.000000e+00 : f32
    %138 = vector.broadcast %cst_40 : f32 to vector<8x128xf32>
    %139 = arith.subf %138, %137 : vector<8x128xf32>
    %140 = math.exp %139 : vector<8x128xf32>
    %141 = vector.broadcast %136 : f32 to vector<8x128xf32>
    %142 = arith.mulf %141, %140 : vector<8x128xf32>
    %cst_41 = arith.constant 1.000000e+00 : f32
    %143 = vector.broadcast %cst_41 : f32 to vector<8x128xf32>
    %144 = arith.subf %143, %142 : vector<8x128xf32>
    %145 = arith.mulf %144, %107 : vector<8x128xf32>
    %c6 = arith.constant 6 : index
    %146 = memref.load %arg7[%c6] : memref<27xf32, #tpu.memory_space<smem>>
    %147 = vector.broadcast %146 : f32 to vector<8x128xf32>
    %148 = arith.mulf %142, %147 : vector<8x128xf32>
    %149 = arith.addf %145, %148 : vector<8x128xf32>
    %150 = arith.mulf %144, %112 : vector<8x128xf32>
    %c7 = arith.constant 7 : index
    %151 = memref.load %arg7[%c7] : memref<27xf32, #tpu.memory_space<smem>>
    %152 = vector.broadcast %151 : f32 to vector<8x128xf32>
    %153 = arith.mulf %142, %152 : vector<8x128xf32>
    %154 = arith.addf %150, %153 : vector<8x128xf32>
    %155 = arith.mulf %144, %117 : vector<8x128xf32>
    %c8 = arith.constant 8 : index
    %156 = memref.load %arg7[%c8] : memref<27xf32, #tpu.memory_space<smem>>
    %157 = vector.broadcast %156 : f32 to vector<8x128xf32>
    %158 = arith.mulf %142, %157 : vector<8x128xf32>
    %159 = arith.addf %155, %158 : vector<8x128xf32>
    %c3_42 = arith.constant 3 : index
    %160 = memref.load %arg5[%c3_42] : memref<9xf32, #tpu.memory_space<smem>>
    %161 = vector.broadcast %160 : f32 to vector<8x128xf32>
    %162 = arith.subf %24, %161 : vector<8x128xf32>
    %c3_43 = arith.constant 3 : index
    %163 = memref.load %arg6[%c3_43] : memref<9xf32, #tpu.memory_space<smem>>
    %164 = vector.broadcast %163 : f32 to vector<8x128xf32>
    %165 = arith.subf %27, %164 : vector<8x128xf32>
    %166 = arith.mulf %162, %162 : vector<8x128xf32>
    %167 = arith.mulf %165, %165 : vector<8x128xf32>
    %168 = arith.addf %166, %167 : vector<8x128xf32>
    %c3_44 = arith.constant 3 : index
    %169 = memref.load %arg3[%c3_44] : memref<9xf32, #tpu.memory_space<smem>>
    %cst_45 = arith.constant 1.000000e-30 : f32
    %170 = vector.broadcast %cst_45 : f32 to vector<8x128xf32>
    %171 = arith.maximumf %168, %170 : vector<8x128xf32>
    %172 = math.log %171 : vector<8x128xf32>
    %173 = vector.broadcast %169 : f32 to vector<8x128xf32>
    %174 = arith.mulf %173, %172 : vector<8x128xf32>
    %c3_46 = arith.constant 3 : index
    %175 = memref.load %arg4[%c3_46] : memref<9xf32, #tpu.memory_space<smem>>
    %176 = vector.broadcast %175 : f32 to vector<8x128xf32>
    %177 = arith.addf %174, %176 : vector<8x128xf32>
    %c3_47 = arith.constant 3 : index
    %178 = memref.load %arg2[%c3_47] : memref<9xf32, #tpu.memory_space<smem>>
    %179 = math.exp %177 : vector<8x128xf32>
    %cst_48 = arith.constant 0.000000e+00 : f32
    %180 = vector.broadcast %cst_48 : f32 to vector<8x128xf32>
    %181 = arith.subf %180, %179 : vector<8x128xf32>
    %182 = math.exp %181 : vector<8x128xf32>
    %183 = vector.broadcast %178 : f32 to vector<8x128xf32>
    %184 = arith.mulf %183, %182 : vector<8x128xf32>
    %cst_49 = arith.constant 1.000000e+00 : f32
    %185 = vector.broadcast %cst_49 : f32 to vector<8x128xf32>
    %186 = arith.subf %185, %184 : vector<8x128xf32>
    %187 = arith.mulf %186, %149 : vector<8x128xf32>
    %c9 = arith.constant 9 : index
    %188 = memref.load %arg7[%c9] : memref<27xf32, #tpu.memory_space<smem>>
    %189 = vector.broadcast %188 : f32 to vector<8x128xf32>
    %190 = arith.mulf %184, %189 : vector<8x128xf32>
    %191 = arith.addf %187, %190 : vector<8x128xf32>
    %192 = arith.mulf %186, %154 : vector<8x128xf32>
    %c10 = arith.constant 10 : index
    %193 = memref.load %arg7[%c10] : memref<27xf32, #tpu.memory_space<smem>>
    %194 = vector.broadcast %193 : f32 to vector<8x128xf32>
    %195 = arith.mulf %184, %194 : vector<8x128xf32>
    %196 = arith.addf %192, %195 : vector<8x128xf32>
    %197 = arith.mulf %186, %159 : vector<8x128xf32>
    %c11 = arith.constant 11 : index
    %198 = memref.load %arg7[%c11] : memref<27xf32, #tpu.memory_space<smem>>
    %199 = vector.broadcast %198 : f32 to vector<8x128xf32>
    %200 = arith.mulf %184, %199 : vector<8x128xf32>
    %201 = arith.addf %197, %200 : vector<8x128xf32>
    %c4_50 = arith.constant 4 : index
    %202 = memref.load %arg5[%c4_50] : memref<9xf32, #tpu.memory_space<smem>>
    %203 = vector.broadcast %202 : f32 to vector<8x128xf32>
    %204 = arith.subf %24, %203 : vector<8x128xf32>
    %c4_51 = arith.constant 4 : index
    %205 = memref.load %arg6[%c4_51] : memref<9xf32, #tpu.memory_space<smem>>
    %206 = vector.broadcast %205 : f32 to vector<8x128xf32>
    %207 = arith.subf %27, %206 : vector<8x128xf32>
    %208 = arith.mulf %204, %204 : vector<8x128xf32>
    %209 = arith.mulf %207, %207 : vector<8x128xf32>
    %210 = arith.addf %208, %209 : vector<8x128xf32>
    %c4_52 = arith.constant 4 : index
    %211 = memref.load %arg3[%c4_52] : memref<9xf32, #tpu.memory_space<smem>>
    %cst_53 = arith.constant 1.000000e-30 : f32
    %212 = vector.broadcast %cst_53 : f32 to vector<8x128xf32>
    %213 = arith.maximumf %210, %212 : vector<8x128xf32>
    %214 = math.log %213 : vector<8x128xf32>
    %215 = vector.broadcast %211 : f32 to vector<8x128xf32>
    %216 = arith.mulf %215, %214 : vector<8x128xf32>
    %c4_54 = arith.constant 4 : index
    %217 = memref.load %arg4[%c4_54] : memref<9xf32, #tpu.memory_space<smem>>
    %218 = vector.broadcast %217 : f32 to vector<8x128xf32>
    %219 = arith.addf %216, %218 : vector<8x128xf32>
    %c4_55 = arith.constant 4 : index
    %220 = memref.load %arg2[%c4_55] : memref<9xf32, #tpu.memory_space<smem>>
    %221 = math.exp %219 : vector<8x128xf32>
    %cst_56 = arith.constant 0.000000e+00 : f32
    %222 = vector.broadcast %cst_56 : f32 to vector<8x128xf32>
    %223 = arith.subf %222, %221 : vector<8x128xf32>
    %224 = math.exp %223 : vector<8x128xf32>
    %225 = vector.broadcast %220 : f32 to vector<8x128xf32>
    %226 = arith.mulf %225, %224 : vector<8x128xf32>
    %cst_57 = arith.constant 1.000000e+00 : f32
    %227 = vector.broadcast %cst_57 : f32 to vector<8x128xf32>
    %228 = arith.subf %227, %226 : vector<8x128xf32>
    %229 = arith.mulf %228, %191 : vector<8x128xf32>
    %c12 = arith.constant 12 : index
    %230 = memref.load %arg7[%c12] : memref<27xf32, #tpu.memory_space<smem>>
    %231 = vector.broadcast %230 : f32 to vector<8x128xf32>
    %232 = arith.mulf %226, %231 : vector<8x128xf32>
    %233 = arith.addf %229, %232 : vector<8x128xf32>
    %234 = arith.mulf %228, %196 : vector<8x128xf32>
    %c13 = arith.constant 13 : index
    %235 = memref.load %arg7[%c13] : memref<27xf32, #tpu.memory_space<smem>>
    %236 = vector.broadcast %235 : f32 to vector<8x128xf32>
    %237 = arith.mulf %226, %236 : vector<8x128xf32>
    %238 = arith.addf %234, %237 : vector<8x128xf32>
    %239 = arith.mulf %228, %201 : vector<8x128xf32>
    %c14 = arith.constant 14 : index
    %240 = memref.load %arg7[%c14] : memref<27xf32, #tpu.memory_space<smem>>
    %241 = vector.broadcast %240 : f32 to vector<8x128xf32>
    %242 = arith.mulf %226, %241 : vector<8x128xf32>
    %243 = arith.addf %239, %242 : vector<8x128xf32>
    %c5_58 = arith.constant 5 : index
    %244 = memref.load %arg5[%c5_58] : memref<9xf32, #tpu.memory_space<smem>>
    %245 = vector.broadcast %244 : f32 to vector<8x128xf32>
    %246 = arith.subf %24, %245 : vector<8x128xf32>
    %c5_59 = arith.constant 5 : index
    %247 = memref.load %arg6[%c5_59] : memref<9xf32, #tpu.memory_space<smem>>
    %248 = vector.broadcast %247 : f32 to vector<8x128xf32>
    %249 = arith.subf %27, %248 : vector<8x128xf32>
    %250 = arith.mulf %246, %246 : vector<8x128xf32>
    %251 = arith.mulf %249, %249 : vector<8x128xf32>
    %252 = arith.addf %250, %251 : vector<8x128xf32>
    %c5_60 = arith.constant 5 : index
    %253 = memref.load %arg3[%c5_60] : memref<9xf32, #tpu.memory_space<smem>>
    %cst_61 = arith.constant 1.000000e-30 : f32
    %254 = vector.broadcast %cst_61 : f32 to vector<8x128xf32>
    %255 = arith.maximumf %252, %254 : vector<8x128xf32>
    %256 = math.log %255 : vector<8x128xf32>
    %257 = vector.broadcast %253 : f32 to vector<8x128xf32>
    %258 = arith.mulf %257, %256 : vector<8x128xf32>
    %c5_62 = arith.constant 5 : index
    %259 = memref.load %arg4[%c5_62] : memref<9xf32, #tpu.memory_space<smem>>
    %260 = vector.broadcast %259 : f32 to vector<8x128xf32>
    %261 = arith.addf %258, %260 : vector<8x128xf32>
    %c5_63 = arith.constant 5 : index
    %262 = memref.load %arg2[%c5_63] : memref<9xf32, #tpu.memory_space<smem>>
    %263 = math.exp %261 : vector<8x128xf32>
    %cst_64 = arith.constant 0.000000e+00 : f32
    %264 = vector.broadcast %cst_64 : f32 to vector<8x128xf32>
    %265 = arith.subf %264, %263 : vector<8x128xf32>
    %266 = math.exp %265 : vector<8x128xf32>
    %267 = vector.broadcast %262 : f32 to vector<8x128xf32>
    %268 = arith.mulf %267, %266 : vector<8x128xf32>
    %cst_65 = arith.constant 1.000000e+00 : f32
    %269 = vector.broadcast %cst_65 : f32 to vector<8x128xf32>
    %270 = arith.subf %269, %268 : vector<8x128xf32>
    %271 = arith.mulf %270, %233 : vector<8x128xf32>
    %c15 = arith.constant 15 : index
    %272 = memref.load %arg7[%c15] : memref<27xf32, #tpu.memory_space<smem>>
    %273 = vector.broadcast %272 : f32 to vector<8x128xf32>
    %274 = arith.mulf %268, %273 : vector<8x128xf32>
    %275 = arith.addf %271, %274 : vector<8x128xf32>
    %276 = arith.mulf %270, %238 : vector<8x128xf32>
    %c16 = arith.constant 16 : index
    %277 = memref.load %arg7[%c16] : memref<27xf32, #tpu.memory_space<smem>>
    %278 = vector.broadcast %277 : f32 to vector<8x128xf32>
    %279 = arith.mulf %268, %278 : vector<8x128xf32>
    %280 = arith.addf %276, %279 : vector<8x128xf32>
    %281 = arith.mulf %270, %243 : vector<8x128xf32>
    %c17 = arith.constant 17 : index
    %282 = memref.load %arg7[%c17] : memref<27xf32, #tpu.memory_space<smem>>
    %283 = vector.broadcast %282 : f32 to vector<8x128xf32>
    %284 = arith.mulf %268, %283 : vector<8x128xf32>
    %285 = arith.addf %281, %284 : vector<8x128xf32>
    %c6_66 = arith.constant 6 : index
    %286 = memref.load %arg5[%c6_66] : memref<9xf32, #tpu.memory_space<smem>>
    %287 = vector.broadcast %286 : f32 to vector<8x128xf32>
    %288 = arith.subf %24, %287 : vector<8x128xf32>
    %c6_67 = arith.constant 6 : index
    %289 = memref.load %arg6[%c6_67] : memref<9xf32, #tpu.memory_space<smem>>
    %290 = vector.broadcast %289 : f32 to vector<8x128xf32>
    %291 = arith.subf %27, %290 : vector<8x128xf32>
    %292 = arith.mulf %288, %288 : vector<8x128xf32>
    %293 = arith.mulf %291, %291 : vector<8x128xf32>
    %294 = arith.addf %292, %293 : vector<8x128xf32>
    %c6_68 = arith.constant 6 : index
    %295 = memref.load %arg3[%c6_68] : memref<9xf32, #tpu.memory_space<smem>>
    %cst_69 = arith.constant 1.000000e-30 : f32
    %296 = vector.broadcast %cst_69 : f32 to vector<8x128xf32>
    %297 = arith.maximumf %294, %296 : vector<8x128xf32>
    %298 = math.log %297 : vector<8x128xf32>
    %299 = vector.broadcast %295 : f32 to vector<8x128xf32>
    %300 = arith.mulf %299, %298 : vector<8x128xf32>
    %c6_70 = arith.constant 6 : index
    %301 = memref.load %arg4[%c6_70] : memref<9xf32, #tpu.memory_space<smem>>
    %302 = vector.broadcast %301 : f32 to vector<8x128xf32>
    %303 = arith.addf %300, %302 : vector<8x128xf32>
    %c6_71 = arith.constant 6 : index
    %304 = memref.load %arg2[%c6_71] : memref<9xf32, #tpu.memory_space<smem>>
    %305 = math.exp %303 : vector<8x128xf32>
    %cst_72 = arith.constant 0.000000e+00 : f32
    %306 = vector.broadcast %cst_72 : f32 to vector<8x128xf32>
    %307 = arith.subf %306, %305 : vector<8x128xf32>
    %308 = math.exp %307 : vector<8x128xf32>
    %309 = vector.broadcast %304 : f32 to vector<8x128xf32>
    %310 = arith.mulf %309, %308 : vector<8x128xf32>
    %cst_73 = arith.constant 1.000000e+00 : f32
    %311 = vector.broadcast %cst_73 : f32 to vector<8x128xf32>
    %312 = arith.subf %311, %310 : vector<8x128xf32>
    %313 = arith.mulf %312, %275 : vector<8x128xf32>
    %c18 = arith.constant 18 : index
    %314 = memref.load %arg7[%c18] : memref<27xf32, #tpu.memory_space<smem>>
    %315 = vector.broadcast %314 : f32 to vector<8x128xf32>
    %316 = arith.mulf %310, %315 : vector<8x128xf32>
    %317 = arith.addf %313, %316 : vector<8x128xf32>
    %318 = arith.mulf %312, %280 : vector<8x128xf32>
    %c19 = arith.constant 19 : index
    %319 = memref.load %arg7[%c19] : memref<27xf32, #tpu.memory_space<smem>>
    %320 = vector.broadcast %319 : f32 to vector<8x128xf32>
    %321 = arith.mulf %310, %320 : vector<8x128xf32>
    %322 = arith.addf %318, %321 : vector<8x128xf32>
    %323 = arith.mulf %312, %285 : vector<8x128xf32>
    %c20 = arith.constant 20 : index
    %324 = memref.load %arg7[%c20] : memref<27xf32, #tpu.memory_space<smem>>
    %325 = vector.broadcast %324 : f32 to vector<8x128xf32>
    %326 = arith.mulf %310, %325 : vector<8x128xf32>
    %327 = arith.addf %323, %326 : vector<8x128xf32>
    %c7_74 = arith.constant 7 : index
    %328 = memref.load %arg5[%c7_74] : memref<9xf32, #tpu.memory_space<smem>>
    %329 = vector.broadcast %328 : f32 to vector<8x128xf32>
    %330 = arith.subf %24, %329 : vector<8x128xf32>
    %c7_75 = arith.constant 7 : index
    %331 = memref.load %arg6[%c7_75] : memref<9xf32, #tpu.memory_space<smem>>
    %332 = vector.broadcast %331 : f32 to vector<8x128xf32>
    %333 = arith.subf %27, %332 : vector<8x128xf32>
    %334 = arith.mulf %330, %330 : vector<8x128xf32>
    %335 = arith.mulf %333, %333 : vector<8x128xf32>
    %336 = arith.addf %334, %335 : vector<8x128xf32>
    %c7_76 = arith.constant 7 : index
    %337 = memref.load %arg3[%c7_76] : memref<9xf32, #tpu.memory_space<smem>>
    %cst_77 = arith.constant 1.000000e-30 : f32
    %338 = vector.broadcast %cst_77 : f32 to vector<8x128xf32>
    %339 = arith.maximumf %336, %338 : vector<8x128xf32>
    %340 = math.log %339 : vector<8x128xf32>
    %341 = vector.broadcast %337 : f32 to vector<8x128xf32>
    %342 = arith.mulf %341, %340 : vector<8x128xf32>
    %c7_78 = arith.constant 7 : index
    %343 = memref.load %arg4[%c7_78] : memref<9xf32, #tpu.memory_space<smem>>
    %344 = vector.broadcast %343 : f32 to vector<8x128xf32>
    %345 = arith.addf %342, %344 : vector<8x128xf32>
    %c7_79 = arith.constant 7 : index
    %346 = memref.load %arg2[%c7_79] : memref<9xf32, #tpu.memory_space<smem>>
    %347 = math.exp %345 : vector<8x128xf32>
    %cst_80 = arith.constant 0.000000e+00 : f32
    %348 = vector.broadcast %cst_80 : f32 to vector<8x128xf32>
    %349 = arith.subf %348, %347 : vector<8x128xf32>
    %350 = math.exp %349 : vector<8x128xf32>
    %351 = vector.broadcast %346 : f32 to vector<8x128xf32>
    %352 = arith.mulf %351, %350 : vector<8x128xf32>
    %cst_81 = arith.constant 1.000000e+00 : f32
    %353 = vector.broadcast %cst_81 : f32 to vector<8x128xf32>
    %354 = arith.subf %353, %352 : vector<8x128xf32>
    %355 = arith.mulf %354, %317 : vector<8x128xf32>
    %c21 = arith.constant 21 : index
    %356 = memref.load %arg7[%c21] : memref<27xf32, #tpu.memory_space<smem>>
    %357 = vector.broadcast %356 : f32 to vector<8x128xf32>
    %358 = arith.mulf %352, %357 : vector<8x128xf32>
    %359 = arith.addf %355, %358 : vector<8x128xf32>
    %360 = arith.mulf %354, %322 : vector<8x128xf32>
    %c22 = arith.constant 22 : index
    %361 = memref.load %arg7[%c22] : memref<27xf32, #tpu.memory_space<smem>>
    %362 = vector.broadcast %361 : f32 to vector<8x128xf32>
    %363 = arith.mulf %352, %362 : vector<8x128xf32>
    %364 = arith.addf %360, %363 : vector<8x128xf32>
    %365 = arith.mulf %354, %327 : vector<8x128xf32>
    %c23 = arith.constant 23 : index
    %366 = memref.load %arg7[%c23] : memref<27xf32, #tpu.memory_space<smem>>
    %367 = vector.broadcast %366 : f32 to vector<8x128xf32>
    %368 = arith.mulf %352, %367 : vector<8x128xf32>
    %369 = arith.addf %365, %368 : vector<8x128xf32>
    %c8_82 = arith.constant 8 : index
    %370 = memref.load %arg5[%c8_82] : memref<9xf32, #tpu.memory_space<smem>>
    %371 = vector.broadcast %370 : f32 to vector<8x128xf32>
    %372 = arith.subf %24, %371 : vector<8x128xf32>
    %c8_83 = arith.constant 8 : index
    %373 = memref.load %arg6[%c8_83] : memref<9xf32, #tpu.memory_space<smem>>
    %374 = vector.broadcast %373 : f32 to vector<8x128xf32>
    %375 = arith.subf %27, %374 : vector<8x128xf32>
    %376 = arith.mulf %372, %372 : vector<8x128xf32>
    %377 = arith.mulf %375, %375 : vector<8x128xf32>
    %378 = arith.addf %376, %377 : vector<8x128xf32>
    %c8_84 = arith.constant 8 : index
    %379 = memref.load %arg3[%c8_84] : memref<9xf32, #tpu.memory_space<smem>>
    %cst_85 = arith.constant 1.000000e-30 : f32
    %380 = vector.broadcast %cst_85 : f32 to vector<8x128xf32>
    %381 = arith.maximumf %378, %380 : vector<8x128xf32>
    %382 = math.log %381 : vector<8x128xf32>
    %383 = vector.broadcast %379 : f32 to vector<8x128xf32>
    %384 = arith.mulf %383, %382 : vector<8x128xf32>
    %c8_86 = arith.constant 8 : index
    %385 = memref.load %arg4[%c8_86] : memref<9xf32, #tpu.memory_space<smem>>
    %386 = vector.broadcast %385 : f32 to vector<8x128xf32>
    %387 = arith.addf %384, %386 : vector<8x128xf32>
    %c8_87 = arith.constant 8 : index
    %388 = memref.load %arg2[%c8_87] : memref<9xf32, #tpu.memory_space<smem>>
    %389 = math.exp %387 : vector<8x128xf32>
    %cst_88 = arith.constant 0.000000e+00 : f32
    %390 = vector.broadcast %cst_88 : f32 to vector<8x128xf32>
    %391 = arith.subf %390, %389 : vector<8x128xf32>
    %392 = math.exp %391 : vector<8x128xf32>
    %393 = vector.broadcast %388 : f32 to vector<8x128xf32>
    %394 = arith.mulf %393, %392 : vector<8x128xf32>
    %cst_89 = arith.constant 1.000000e+00 : f32
    %395 = vector.broadcast %cst_89 : f32 to vector<8x128xf32>
    %396 = arith.subf %395, %394 : vector<8x128xf32>
    %397 = arith.mulf %396, %359 : vector<8x128xf32>
    %c24 = arith.constant 24 : index
    %398 = memref.load %arg7[%c24] : memref<27xf32, #tpu.memory_space<smem>>
    %399 = vector.broadcast %398 : f32 to vector<8x128xf32>
    %400 = arith.mulf %394, %399 : vector<8x128xf32>
    %401 = arith.addf %397, %400 : vector<8x128xf32>
    %402 = arith.mulf %396, %364 : vector<8x128xf32>
    %c25 = arith.constant 25 : index
    %403 = memref.load %arg7[%c25] : memref<27xf32, #tpu.memory_space<smem>>
    %404 = vector.broadcast %403 : f32 to vector<8x128xf32>
    %405 = arith.mulf %394, %404 : vector<8x128xf32>
    %406 = arith.addf %402, %405 : vector<8x128xf32>
    %407 = arith.mulf %396, %369 : vector<8x128xf32>
    %c26 = arith.constant 26 : index
    %408 = memref.load %arg7[%c26] : memref<27xf32, #tpu.memory_space<smem>>
    %409 = vector.broadcast %408 : f32 to vector<8x128xf32>
    %410 = arith.mulf %394, %409 : vector<8x128xf32>
    %411 = arith.addf %407, %410 : vector<8x128xf32>
    %c0_90 = arith.constant 0 : index
    %c0_91 = arith.constant 0 : index
    %c0_92 = arith.constant 0 : index
    %c0_93 = arith.constant 0 : index
    %412 = vector.load %arg9[%c0_90, %c0_91, %c0_92, %c0_93] : memref<1x3x8x128xf32, #tpu.memory_space<vmem>>, vector<1x1x8x128xf32>
    %413 = vector.shape_cast %412 : vector<1x1x8x128xf32> to vector<8x128xf32>
    %414 = vector.shape_cast %401 : vector<8x128xf32> to vector<1x1x8x128xf32>
    tpu.vector_store %arg9[%c0_90, %c0_91, %c0_92, %c0_93], %414 {strides = array<i32>} : memref<1x3x8x128xf32, #tpu.memory_space<vmem>>, vector<1x1x8x128xf32>,
    %c0_94 = arith.constant 0 : index
    %c1_95 = arith.constant 1 : index
    %c0_96 = arith.constant 0 : index
    %c0_97 = arith.constant 0 : index
    %415 = vector.load %arg9[%c0_94, %c1_95, %c0_96, %c0_97] : memref<1x3x8x128xf32, #tpu.memory_space<vmem>>, vector<1x1x8x128xf32>
    %416 = vector.shape_cast %415 : vector<1x1x8x128xf32> to vector<8x128xf32>
    %417 = vector.shape_cast %406 : vector<8x128xf32> to vector<1x1x8x128xf32>
    tpu.vector_store %arg9[%c0_94, %c1_95, %c0_96, %c0_97], %417 {strides = array<i32>} : memref<1x3x8x128xf32, #tpu.memory_space<vmem>>, vector<1x1x8x128xf32>,
    %c0_98 = arith.constant 0 : index
    %c2_99 = arith.constant 2 : index
    %c0_100 = arith.constant 0 : index
    %c0_101 = arith.constant 0 : index
    %418 = vector.load %arg9[%c0_98, %c2_99, %c0_100, %c0_101] : memref<1x3x8x128xf32, #tpu.memory_space<vmem>>, vector<1x1x8x128xf32>
    %419 = vector.shape_cast %418 : vector<1x1x8x128xf32> to vector<8x128xf32>
    %420 = vector.shape_cast %411 : vector<8x128xf32> to vector<1x1x8x128xf32>
    tpu.vector_store %arg9[%c0_98, %c2_99, %c0_100, %c0_101], %420 {strides = array<i32>} : memref<1x3x8x128xf32, #tpu.memory_space<vmem>>, vector<1x1x8x128xf32>,
    return
  }
  func.func @transform_0(%arg0: i32, %arg1: i32) -> i32 {
    %c0_i32 = arith.constant 0 : i32
    %c0_i32_0 = arith.constant 0 : i32
    return %c0_i32 : i32
  }
  func.func @transform_1(%arg0: i32, %arg1: i32) -> i32 {
    %c0_i32 = arith.constant 0 : i32
    %c0_i32_0 = arith.constant 0 : i32
    return %c0_i32 : i32
  }
  func.func @transform_2(%arg0: i32, %arg1: i32) -> i32 {
    %c0_i32 = arith.constant 0 : i32
    %c0_i32_0 = arith.constant 0 : i32
    return %c0_i32 : i32
  }
  func.func @transform_3(%arg0: i32, %arg1: i32) -> i32 {
    %c0_i32 = arith.constant 0 : i32
    %c0_i32_0 = arith.constant 0 : i32
    return %c0_i32 : i32
  }
  func.func @transform_4(%arg0: i32, %arg1: i32) -> i32 {
    %c0_i32 = arith.constant 0 : i32
    %c0_i32_0 = arith.constant 0 : i32
    return %c0_i32 : i32
  }
  func.func @transform_5(%arg0: i32, %arg1: i32) -> i32 {
    %c0_i32 = arith.constant 0 : i32
    %c0_i32_0 = arith.constant 0 : i32
    return %c0_i32 : i32
  }
  func.func @transform_6(%arg0: i32, %arg1: i32) -> (i32, i32, i32, i32) {
    %c0_i32 = arith.constant 0 : i32
    %c0_i32_0 = arith.constant 0 : i32
    %c0_i32_1 = arith.constant 0 : i32
    return %arg0, %c0_i32, %arg1, %c0_i32_0 : i32, i32, i32, i32
  }
  func.func @transform_7(%arg0: i32, %arg1: i32) -> (i32, i32, i32, i32) {
    %c0_i32 = arith.constant 0 : i32
    %c0_i32_0 = arith.constant 0 : i32
    %c0_i32_1 = arith.constant 0 : i32
    return %arg0, %c0_i32, %arg1, %c0_i32_0 : i32, i32, i32, i32
  }
}

</mosaic_0001>

<bundles_post_ra>
// kernel: tpu_custom_call.1
= control target key start
LH: loop header
LB: loop body
LE: loop exit
PB: predicated region body
PF: predicated region fallthrough
CT: control target
= control target key end

     0   :  { %s1937_s0 = inlined_call_operand.vmem [shape: f32[9], index: 0, kind: input, shape index: {}]   ;;  %s1938_s1 = inlined_call_operand.vmem [shape: f32[9], index: 1, kind: input, shape index: {}]   ;;  %s1939_s2 = inlined_call_operand.vmem [shape: f32[9], index: 2, kind: input, shape index: {}]   ;;  %s1940_s3 = inlined_call_operand.vmem [shape: f32[9], index: 3, kind: input, shape index: {}]   ;;  %s1941_s4 = inlined_call_operand.vmem [shape: f32[9], index: 4, kind: input, shape index: {}]   ;;  %s1942_s5 = inlined_call_operand.vmem [shape: f32[27], index: 5, kind: input, shape index: {}]   ;;  %s1943_s6 = inlined_call_operand.hbm [shape: f32[2,3,8,128], index: 6, kind: input, shape index: {}, may-alias: {6,7}]   ;;  %s1944_s7 = inlined_call_operand.hbm [shape: f32[2,3,8,128], index: 7, kind: output, shape index: {}, may-alias: {6,7}]  }
   0x1   :  { %1948 = sst [smem:[#allocation22_spill]] %s1937_s0 }
   0x2   :  { %1949 = sst [smem:[#allocation23_spill]] %s1938_s1 }
   0x3   :  { %1950 = sst [smem:[#allocation24_spill]] %s1939_s2 }
   0x4   :  { %1951 = sst [smem:[#allocation25_spill]] %s1940_s3 }
   0x5   :  { %12 = vsyncpa [#allocation5], 0 }
   0x6   :  { %13 = vsyncpa [#allocation7], 0 }
   0x7   :  { %14 = vsyncpa [#allocation10], 0 }
   0x8   :  { %15 = vsyncpa [#allocation13], 0 }
   0x9   :  { %16 = vsyncpa [#allocation3], 0 }
   0xa   :  { %18 = vsyncpa [#allocation3 + $0x1], 0 }
   0xb   :  { %19 = vsyncpa [#allocation4], 0 }
   0xc   :  { %21 = vsyncpa [#allocation4 + $0x1], 0  ;;  %s1506_s24 = smov 0   ;;  %s1508_s25 = smov 0  }
   0xd   :  { %s1510_s26 = smov 0   ;;  %s1512_s27 = smov 0  }
   0xe   :  { %s1514_s28 = smov 0   ;;  %s1516_s29 = smov 0  }
   0xf LB: > { %s1952_s1 = sld [smem:[#allocation23_spill]]  ;;  %s961_s10 = sadd.s32 4294967295, %s1452_s29   ;;  %s1452_s29 = sphi %s1516_s29, %s27_s29   ;;  %s1448_s28 = sphi %s1514_s28, %s1973_s28   ;;  %s1444_s27 = sphi %s1512_s27, %s1972_s27   ;;  %s1440_s26 = sphi %s1510_s26, %s1971_s26   ;;  %s1436_s25 = sphi %s1508_s25, %s1970_s25   ;;  %s1432_s24 = sphi %s1506_s24, %s1969_s24  }
  0x10   : > { %p963_p0 = scmp.ge.s32.totalorder %s1452_s29, 1  ;;  %p1543_p1 = scmp.eq.s32.totalorder %s961_s10, 0 }
  0x11   : > { %p226_p2 = scmp.lt.s32.totalorder %s1452_s29, 3  ;;  %s1955_s3 = sld [smem:[#allocation25_spill]] }
  0x12   : > { %s1953_s11 = scalar_select %p1543_p1, 1, 0 }
  0x13   : > { %p1548_p3 = pnand %p963_p0, %p226_p2  ;;  %s1956_s0 = sld [smem:[#allocation22_spill]] }
  0x14   : > { %s1958_s2 = sld [smem:[#allocation24_spill]] }
  0x15   : > { %s250_s9 = sshll.u32 %s1952_s1, 4  ;;  %p1085_p5 = pneg %p1548_p3  ;;  %s251_s9 = int_to_ptr.vmem [resolvable:$true] %s250_s9 }
  0x16   : > { %s1954_s12 = scalar_select %p1548_p3, 1, 0 }
  0x17   : > { %s272_s15 = sshll.u32 %s1955_s3, 4  ;;  %p1563_p6 = pnand %p1085_p5, %p1543_p1  ;;  %s273_s15 = int_to_ptr.vmem [resolvable:$true] %s272_s15 }
  0x18   : > { %s1238_s23 = scalar_lea.vmem %s251_s9, 16  ;;  %p1246_p11 = scmp.lt.s32.totalorder %s251_s9, %s251_s9 }
  0x19   : > { %s239_s18 = sshll.u32 %s1956_s0, 4  ;;  %p1239_p7 = scmp.ne.s32.totalorder %s251_s9, %s1238_s23  ;;  %s1567_s18 = int_to_ptr.vmem [resolvable:$true] %s239_s18 }
  0x1a   : > { %s261_s22 = sshll.u32 %s1958_s2, 4  ;;  %p1574_p8 = pneg %p1563_p6  ;;  %s262_s22 = int_to_ptr.vmem [resolvable:$true] %s261_s22 }
  0x1b   : > { %p1247_p12 = scmp.lt.s32.totalorder %s1238_s23, %s1238_s23 }
  0x1c   : > { %p1241_p9 = pnand %p1574_p8, %p1239_p7 }
  0x1d   : > { %p1248_p13 = por %p1247_p12, %p1246_p11 }
  0x1e   : > { %p1242_p10 = pneg %p1241_p9 }
  0x20   : > { %p1249_p0 = pnand %p1248_p13, %p1242_p10 }
  0x22   : > { %1252 = shalt.err (!%p1249_p0)
}
  0x23   : > { %s1454_s8 = smov [#allocation6]   ;;  %s1253_s13 = scalar_lea.vmem %s273_s15, 16 }
  0x24   : > { %1091 = dma.vmem_to_smem (!%p1563_p6), %s251_s9, 16, %s1454_s8, [#allocation7]  }
  0x25   : > { %p1254_p2 = scmp.ne.s32.totalorder %s273_s15, %s1253_s13  ;;  %p1261_p3 = scmp.lt.s32.totalorder %s273_s15, %s273_s15 }
  0x26   : > { %p1262_p1 = scmp.lt.s32.totalorder %s1253_s13, %s1253_s13 }
  0x27   : > { %p1256_p5 = pnand %p1254_p2, %p1574_p8 }
  0x28   : > { %p1263_p7 = por %p1262_p1, %p1261_p3 }
  0x29   : > { %p1257_p4 = pneg %p1256_p5 }
  0x2b   : > { %p1264_p9 = pnand %p1263_p7, %p1257_p4 }
  0x2d   : > { %1267 = shalt.err (!%p1264_p9)
}
  0x2e   : > { %s1455_s14 = smov [#allocation9]   ;;  %s1268_s16 = scalar_lea.vmem %s1567_s18, 16 }
  0x2f   : > { %1097 = dma.vmem_to_smem (!%p1563_p6), %s273_s15, 16, %s1455_s14, [#allocation10]  }
  0x30   : > { %p1269_p10 = scmp.ne.s32.totalorder %s1567_s18, %s1268_s16  ;;  %p1276_p13 = scmp.lt.s32.totalorder %s1567_s18, %s1567_s18 }
  0x31   : > { %p1277_p0 = scmp.lt.s32.totalorder %s1268_s16, %s1268_s16 }
  0x32   : > { %p1271_p11 = pnand %p1269_p10, %p1574_p8 }
  0x33   : > { %p1278_p2 = por %p1277_p0, %p1276_p13 }
  0x34   : > { %p1272_p12 = pneg %p1271_p11 }
  0x36   : > { %p1279_p1 = pnand %p1278_p2, %p1272_p12 }
  0x38   : > { %1282 = shalt.err (!%p1279_p1)
}
  0x39   : > { %s1456_s9 = smov [#allocation2]   ;;  %s1283_s15 = scalar_lea.vmem %s262_s22, 16 }
  0x3a   : > { %1088 = dma.vmem_to_smem (!%p1563_p6), %s1567_s18, 16, %s1456_s9, [#allocation5]  }
  0x3b   : > { %p1284_p3 = scmp.ne.s32.totalorder %s262_s22, %s1283_s15  ;;  %p1291_p7 = scmp.lt.s32.totalorder %s262_s22, %s262_s22 }
  0x3c   : > { %p1292_p9 = scmp.lt.s32.totalorder %s1283_s15, %s1283_s15 }
  0x3d   : > { %p1286_p4 = pnand %p1284_p3, %p1574_p8 }
  0x3e   : > { %p1293_p10 = por %p1292_p9, %p1291_p7 }
  0x3f   : > { %p1287_p5 = pneg %p1286_p4 }
  0x41   : > { %p1294_p11 = pnand %p1293_p10, %p1287_p5 }
  0x43   : > { %1297 = shalt.err (!%p1294_p11)
}
  0x44   : > { %s1457_s21 = smov [#allocation8]   ;;  %s283_s8 = sshll.u32 %s1941_s4, 4  ;;  %s284_s8 = int_to_ptr.vmem [resolvable:$true] %s283_s8 }
  0x45   : > { %1094 = dma.vmem_to_smem (!%p1563_p6), %s262_s22, 16, %s1457_s21, [#allocation7]  }
  0x46   : > { %s294_s16 = sshll.u32 %s1942_s5, 4  ;;  %s1298_s9 = scalar_lea.vmem %s284_s8, 16  ;;  %s295_s16 = int_to_ptr.vmem [resolvable:$true] %s294_s16 }
  0x47   : > { %p1299_p12 = scmp.ne.s32.totalorder %s284_s8, %s1298_s9  ;;  %p1306_p2 = scmp.lt.s32.totalorder %s284_s8, %s284_s8 }
  0x48   : > { %p1307_p1 = scmp.lt.s32.totalorder %s1298_s9, %s1298_s9 }
  0x49   : > { %p1301_p13 = pnand %p1299_p12, %p1574_p8 }
  0x4a   : > { %p1308_p3 = por %p1307_p1, %p1306_p2 }
  0x4b   : > { %p1302_p0 = pneg %p1301_p13 }
  0x4d   : > { %p1309_p4 = pnand %p1308_p3, %p1302_p0 }
  0x4f   : > { %1312 = shalt.err (!%p1309_p4)
}
  0x50   : > { %s1458_s22 = smov [#allocation11]   ;;  %s1313_s17 = scalar_lea.vmem %s295_s16, 16 }
  0x51   : > { %1100 = dma.vmem_to_smem (!%p1563_p6), %s284_s8, 16, %s1458_s22, [#allocation10]  }
  0x52   : > { %p1314_p5 = scmp.ne.s32.totalorder %s295_s16, %s1313_s17  ;;  %p1321_p10 = scmp.lt.s32.totalorder %s295_s16, %s295_s16 }
  0x53   : > { %p1322_p11 = scmp.lt.s32.totalorder %s1313_s17, %s1313_s17 }
  0x54   : > { %p1316_p7 = pnand %p1314_p5, %p1574_p8 }
  0x55   : > { %p1323_p12 = por %p1322_p11, %p1321_p10 }
  0x56   : > { %p1317_p9 = pneg %p1316_p7 }
  0x58   : > { %p1324_p13 = pnand %p1323_p12, %p1317_p9 }
  0x5a   : > { %1327 = shalt.err (!%p1324_p13)
}
  0x5b   : > { %s1459_s20 = smov [#allocation12]   ;;  %s962_s30 = sadd.s32 4294967294, %s1452_s29  }
  0x5c   : > { %1103 = dma.vmem_to_smem (!%p1563_p6), %s295_s16, 16, %s1459_s20, [#allocation13]  }
  0x5d   : > { %s39_s15 = sadd.s32 1, %s1448_s28  ;;  %s174_s21 = sadd.s32 1, %s1440_s26 }
  0x5e   : > { %p41_p8 = scmp.ge.s32.totalorder %s39_s15, 2  ;;  %p181_p0 = scmp.ne.s32.totalorder %s1440_s26, %s1436_s25 }
  0x5f   : > { %p182_p2 = scmp.eq.s32.totalorder %s1452_s29, 0  ;;  %p187_p3 = scmp.ne.s32.totalorder %s1436_s25, %s1432_s24 }
  0x60   : > { %s1975_s15 = smov (%p41_p8, %s39_s15), 0  ;;  %p213_p6 = scmp.eq.s32.totalorder %s961_s10, 1 }
  0x61   : > { %p1625_p1 = por %p182_p2, %p181_p0  ;;  %s169_s18 = ssub.s32 %s1448_s28, %s1975_s15 }
  0x62   : > { %p172_p4 = scmp.eq.s32.totalorder %s169_s18, 0  ;;  %p1961_p5 = scmp.ne.s32.totalorder %s1953_s11, 0 }
  0x63   : > { %p1641_p9 = por %p213_p6, %p181_p0  ;;  %p219_p10 = scmp.eq.s32.totalorder %s962_s30, 1 }
  0x64   : > { %p1637_p7 = por %p1961_p5, %p187_p3  ;;  %p1118_p12 = scmp.lt.s32.totalorder %s1452_s29, 2 }
  0x65   : > { %s1646_s13 = scalar_select %p172_p4, %s1440_s26, %s174_s21  }
  0x66   : > { %p1648_p11 = por %p219_p10, %p187_p3  ;;  %s305_s16 = sand.u32 1, %s1440_s26  }
  0x67   : > { %s1054_s10 = smul.u32 384, %s1448_s28  ;;  %p1660_p13 = pnand %p1118_p12, %p1625_p1 }
  0x68   : > { %s1053_s9 = smul.u32 24, %s305_s16  ;;  %s306_s0 = scalar_lea.sflag [#allocation3], %s305_s16 }
  0x69   : > { %s316_s20 = scalar_lea.hbm %s1943_s6, %s1054_s10  ;;  %p1330_p8 = pneg %p1660_p13 }
  0x6a   : > { %s309_s30 = scalar_lea.vmem [#allocation14], %s1053_s9  ;;  %s1460_s2 = smov [#allocation14]  }
  0x6b   : > { %s317_s21 = sshll.u32 %s309_s30, 4  ;;  %s1346_s3 = sshll.u32 %s1460_s2, 4  ;;  %s318_s21 = int_to_ptr.vmem [resolvable:$true] %s317_s21  ;;  %s1347_s3 = int_to_ptr.vmem [resolvable:$false] %s1346_s3 }
  0x6c   : > { %s1341_s1 = scalar_lea.vmem %s318_s21, 384  ;;  %s1348_s10 = scalar_lea.vmem %s1347_s3, 768 }
  0x6d   : > { %p1342_p0 = scmp.ne.s32.totalorder %s318_s21, %s1341_s1  ;;  %p1349_p6 = scmp.lt.s32.totalorder %s318_s21, %s1347_s3 }
  0x6e   : > { %p1350_p1 = scmp.lt.s32.totalorder %s1348_s10, %s1341_s1 }
  0x6f   : > { %p1344_p2 = pnand %p1342_p0, %p1330_p8 }
  0x70   : > { %p1351_p4 = por %p1350_p1, %p1349_p6 }
  0x71   : > { %p1345_p3 = pneg %p1344_p2 }
  0x73   : > { %p1352_p5 = pnand %p1351_p4, %p1345_p3 }
  0x75   : > { %1355 = shalt.err (!%p1352_p5)
}
  0x76   : > { %s1461_s19 = smov 128   ;;  %s1462_s9 = smov 8  }
  0x77   : > { %1107 = dma.hbm_to_vmem [thread:$0]  (!%p1660_p13), %s316_s20, 384, %s318_s21, %s306_s0, %s1461_s19, %s1461_s19, %s1462_s9  }
  0x78   : > { %p1966_p10 = scmp.ne.s32.totalorder %s1954_s12, 0 }
  0x79   : > { %p1967_p12 = scmp.ne.s32.totalorder (!%p1966_p10), %s1953_s11, 0 }
  0x7a   : > { %329 = sbr.rel (%p1966_p10) target bundleno = 300 (0x12c), region = 48 }
  0x7f   : > { %1407 = dma.done.wait (%p1967_p12), [#allocation5], 16  }
  0x80   : > { %1409 = vsyncadd (%p1967_p12), [#allocation5], 4294967280 }
  0x81   : > { %1411 = dma.done.wait (%p1967_p12), [#allocation7], 32  }
  0x82   : > { %1413 = vsyncadd (%p1967_p12), [#allocation7], 4294967264 }
  0x83   : > { %1415 = dma.done.wait (%p1967_p12), [#allocation10], 32  }
  0x84   : > { %1417 = vsyncadd (%p1967_p12), [#allocation10], 4294967264 }
  0x85   : > { %1419 = dma.done.wait (%p1967_p12), [#allocation13], 16  }
  0x86   : > { %1421 = vsyncadd (%p1967_p12), [#allocation13], 4294967280  ;;  %s1687_s0 = sand.u32 1, %s1436_s25  }
  0x87   : > { %s1055_s1 = smul.u32 24, %s1687_s0  ;;  %s356_s2 = scalar_lea.sflag [#allocation3], %s1687_s0 }
  0x89   : > { %s1693_s3 = scalar_lea.vmem [#allocation14], %s1055_s1 }
  0x8a   : > { %1423 = dma.done.wait (%p1637_p7), %s356_s2, 384  }
  0x8b   : > { %1425 = vsyncadd (%p1637_p7), %s356_s2, 4294966912 }
  0x8c   : > { %364 = sfence }
  0x8d   : > { %v392_v0 = vlaneseq  ;;  %s418_s11 = sld [smem:[#allocation9]] }
  0x8e   : > { %s984_s12 = sld [smem:[#allocation9 + $0x1]] }
  0x8f   : > { %v393_v1 = vshrl.u32 %v392_v0, 7  ;;  %v395_v2 = vand.u32 127, %v392_v0  ;;  %s421_s16 = sld [smem:[#allocation11]] }
  0x90   : > { %s985_s22 = sld [smem:[#allocation11 + $0x1]] }
  0x91   : > { %v396_v3 = vmul.u32 128, %v393_v1  ;;  %s992_s17 = sld [smem:[#allocation9 + $0x2]] }
  0x92   : > { %s993_s23 = sld [smem:[#allocation11 + $0x2]] }
  0x93   : > { %v399_v4 = vadd.s32 %v396_v3, %v395_v2  ;;  %v419_v12 = vstv %s418_s11  ;;  %s1000_s20 = sld [smem:[#allocation9 + $0x3]] }
  0x94   : > { %v461_v13 = vstv %s984_s12  ;;  %s1001_s18 = sld [smem:[#allocation11 + $0x3]] }
  0x95   : > { %v400_v5 = vcvt.s32.f32 %v399_v4  ;;  %v422_v19 = vstv %s421_s16  ;;  %s1008_s30 = sld [smem:[#allocation9 + $0x4]] }
  0x96   : > { %v464_v20 = vstv %s985_s22  ;;  %s1009_s21 = sld [smem:[#allocation11 + $0x4]] }
  0x97   : > { %v401_v6 = vmul.f32 0.0625, %v400_v5  ;;  %v503_v21 = vstv %s992_s17  ;;  %s1712_s10 = sld [smem:[#allocation6]] }
  0x98   : > { %v506_v26 = vstv %s993_s23  ;;  %s1714_s19 = sld [smem:[#allocation8]] }
  0x99   : > { %v402_v7 = vfloor.f32 %v401_v6  ;;  %v545_v37 = vstv %s1000_s20  ;;  %s1716_s9 = sld [smem:[#allocation6 + $0x1]] }
  0x9a   : > { %v548_v42 = vstv %s1001_s18  ;;  %s1718_s2 = sld [smem:[#allocation8 + $0x1]] }
  0x9b   : > { %v403_v8 = vmul.f32 16.0, %v402_v7  ;;  %v408_v9 = vadd.f32 1.0, %v402_v7  ;;  %v979_v11 = vadd.f32 -1.0, %v402_v7  ;;  %s1720_s11 = sld [smem:[#allocation6 + $0x2]]  ;;  %v587_v48 = vstv %s1008_s30 }
  0x9c   : > { %s1722_s12 = sld [smem:[#allocation8 + $0x2]]  ;;  %v590_v50 = vstv %s1009_s21 }
  0x9d   : > { %v404_v10 = vsub.f32 %v400_v5, %v403_v8  ;;  %s1016_s16 = sld [smem:[#allocation9 + $0x5]]  ;;  %v431_v56 = vstv %s1712_s10 }
  0x9e   : > { %s1017_s22 = sld [smem:[#allocation11 + $0x5]]  ;;  %v434_v57 = vstv %s1714_s19 }
  0x9f   : > { %vm405_vm0 = vcmp.lt.f32.partialorder %v404_v10, 0.0  ;;  %vm407_vm1 = vcmp.ge.f32.partialorder %v404_v10, 16.0  ;;  %v473_v58 = vstv %s1716_s9  ;;  %s1729_s17 = sld [smem:[#allocation6 + $0x3]] }
  0xa0   : > { %v409_v14 = vsel %vm407_vm1, %v408_v9, %v402_v7  ;;  %v476_v61 = vstv %s1718_s2  ;;  %s1733_s23 = sld [smem:[#allocation8 + $0x3]] }
  0xa1   : > { %v1699_v15 = vsel %vm405_vm0, %v979_v11, %v409_v14  ;;  %v515_v2 = vstv %s1720_s11  ;;  %s1024_s20 = sld [smem:[#allocation9 + $0x6]] }
  0xa2   : > { %v411_v16 = vmul.f32 16.0, %v1699_v15  ;;  %v420_v17 = vsub.f32 %v1699_v15, %v419_v12  ;;  %v462_v18 = vsub.f32 %v1699_v15, %v461_v13  ;;  %v504_v23 = vsub.f32 %v1699_v15, %v503_v21  ;;  %s1025_s18 = sld [smem:[#allocation11 + $0x6]] }
  0xa3   : > { %v546_v41 = vsub.f32 %v1699_v15, %v545_v37  ;;  %v588_v49 = vsub.f32 %v1699_v15, %v587_v48  ;;  %v629_v63 = vstv %s1016_s16  ;;  %v518_v9 = vstv %s1722_s12  ;;  %s1739_s30 = sld [smem:[#allocation6 + $0x4]] }
  0xa4   : > { %v1704_v22 = vsub.f32 %v400_v5, %v411_v16  ;;  %v424_v24 = vmul.f32 %v420_v17, %v420_v17  ;;  %v466_v25 = vmul.f32 %v462_v18, %v462_v18  ;;  %v508_v30 = vmul.f32 %v504_v23, %v504_v23  ;;  %s1011_s21 = sld [smem:[#allocation8 + $0x4]] }
  0xa5   : > { %v550_v44 = vmul.f32 %v546_v41, %v546_v41  ;;  %v592_v52 = vmul.f32 %v588_v49, %v588_v49  ;;  %v630_v3 = vsub.f32 %v1699_v15, %v629_v63  ;;  %v632_v4 = vstv %s1017_s22  ;;  %s1032_s10 = sld [smem:[#allocation9 + $0x7]] }
  0xa6   : > { %v423_v27 = vsub.f32 %v1704_v22, %v422_v19  ;;  %v465_v28 = vsub.f32 %v1704_v22, %v464_v20  ;;  %v507_v29 = vsub.f32 %v1704_v22, %v506_v26  ;;  %v549_v43 = vsub.f32 %v1704_v22, %v548_v42  ;;  %s1033_s19 = sld [smem:[#allocation11 + $0x7]] }
  0xa7   : > { %v591_v51 = vsub.f32 %v1704_v22, %v590_v50  ;;  %v633_v7 = vsub.f32 %v1704_v22, %v632_v4  ;;  %v634_v10 = vmul.f32 %v630_v3, %v630_v3  ;;  %v557_v21 = vstv %s1729_s17  ;;  %s1745_s9 = sld [smem:[#allocation6 + $0x5]] }
  0xa8   : > { %v425_v31 = vmul.f32 %v423_v27, %v423_v27  ;;  %v467_v32 = vmul.f32 %v465_v28, %v465_v28  ;;  %v509_v33 = vmul.f32 %v507_v29, %v507_v29  ;;  %v551_v45 = vmul.f32 %v549_v43, %v549_v43  ;;  %s1747_s2 = sld [smem:[#allocation8 + $0x5]] }
  0xa9   : > { %v593_v53 = vmul.f32 %v591_v51, %v591_v51  ;;  %v635_v13 = vmul.f32 %v633_v7, %v633_v7  ;;  %v560_v26 = vstv %s1733_s23  ;;  %v671_v27 = vstv %s1024_s20  ;;  %s1040_s11 = sld [smem:[#allocation9 + $0x8]] }
  0xaa   : > { %v426_v34 = vadd.f32 %v425_v31, %v424_v24  ;;  %v468_v35 = vadd.f32 %v467_v32, %v466_v25  ;;  %v510_v36 = vadd.f32 %v509_v33, %v508_v30  ;;  %v552_v46 = vadd.f32 %v551_v45, %v550_v44  ;;  %s1041_s12 = sld [smem:[#allocation11 + $0x8]] }
  0xab   : > { %v594_v54 = vadd.f32 %v593_v53, %v592_v52  ;;  %v636_v18 = vadd.f32 %v635_v13, %v634_v10  ;;  %v674_v28 = vstv %s1025_s18  ;;  %v672_v30 = vsub.f32 %v1699_v15, %v671_v27  ;;  %s1751_s16 = sld [smem:[#allocation2]] }
  0xac   : > { %v428_v38 = vmax.f32 %v426_v34, 1e-30  ;;  %v470_v39 = vmax.f32 %v468_v35, 1e-30  ;;  %v512_v40 = vmax.f32 %v510_v36, 1e-30  ;;  %v675_v31 = vsub.f32 %v1704_v22, %v674_v28 }
  0xad   : > { %v554_v47 = vmax.f32 %v552_v46, 1e-30  ;;  %v596_v62 = vmax.f32 %v594_v54, 1e-30  ;;  %v638_v25 = vmax.f32 %v636_v18, 1e-30  ;;  %v676_v33 = vmul.f32 %v672_v30, %v672_v30 }
  0xae   : > { %1184 = vlog2.f32 %v428_v38  ;;  %v677_v34 = vmul.f32 %v675_v31, %v675_v31  ;;  %v599_v38 = vstv %s1739_s30  ;;  %v602_v41 = vstv %s1011_s21  ;;  %s1754_s22 = sld [smem:[#allocation6 + $0x6]] }
  0xaf   : > { %1186 = vlog2.f32 %v470_v39  ;;  %v713_v42 = vstv %s1032_s10  ;;  %v716_v45 = vstv %s1033_s19  ;;  %s1757_s17 = sld [smem:[#allocation8 + $0x6]] }
  0xb0   : > { %1188 = vlog2.f32 %v512_v40  ;;  %v678_v36 = vadd.f32 %v677_v34, %v676_v33  ;;  %v714_v44 = vsub.f32 %v1699_v15, %v713_v42  ;;  %v717_v46 = vsub.f32 %v1704_v22, %v716_v45  ;;  %s1759_s23 = sld [smem:[#allocation12]] }
  0xb1   : > { %1190 = vlog2.f32 %v554_v47  ;;  %v758_v4 = vstv %s1041_s12  ;;  %s1762_s20 = sld [smem:[#allocation12 + $0x1]] }
  0xb2   : > { %1192 = vlog2.f32 %v596_v62  ;;  %v680_v40 = vmax.f32 %v678_v36, 1e-30  ;;  %v718_v48 = vmul.f32 %v714_v44, %v714_v44  ;;  %v719_v50 = vmul.f32 %v717_v46, %v717_v46  ;;  %s1765_s18 = sld [smem:[#allocation12 + $0x2]]  ;;  %v980_v36 = vld [vmem:[%s1693_s3 + $0x8] sm:$0xff] }
  0xb3   : > { %s1767_s30 = sld [smem:[#allocation2 + $0x1]] }
  0xb4   : > { %s1769_s21 = sld [smem:[#allocation12 + $0x3]]  ;;  %v683_v13 = vstv %s1754_s22 }
  0xb5   : > { %s1771_s10 = sld [smem:[#allocation12 + $0x4]] }
  0xb6   : > { %s1774_s19 = sld [smem:[#allocation12 + $0x5]]  ;;  %v447_v28 = vstv %s1759_s23 }
  0xb7   : > { %s1784_s12 = sld [smem:[#allocation12 + $0x7]] }
  0xb8   : > { %s1787_s22 = sld [smem:[#allocation12 + $0x8]]  ;;  %v457_v30 = vstv %s1765_s18 }
  0xb9   : > { %s1802_s23 = sld [smem:[#allocation6 + $0x8]] }
  0xba   : > { %v489_v34 = vstv %s1769_s21  ;;  %s1814_s18 = sld [smem:[#allocation12 + $0xa]] }
  0xbb   : > { %v1185_v55 = vpop.eup %1184  ;;  %s1819_s21 = sld [smem:[#allocation12 + $0xb]] }
  0xbc   : > { %v1187_v59 = vpop.eup %1186  ;;  %v430_v60 = vmul.f32 0.6931472, %v1185_v55 }
  0xbd   : > { %v1189_v0 = vpop.eup %1188  ;;  %v472_v1 = vmul.f32 0.6931472, %v1187_v59 }
  0xbe   : > { %v432_v5 = vmul.f32 %v431_v56, %v430_v60  ;;  %v514_v6 = vmul.f32 0.6931472, %v1189_v0  ;;  %v1191_v19 = vpop.eup %1190  ;;  %v641_v56 = vstv %s1745_s9  ;;  %s1776_s9 = sld [smem:[#allocation2 + $0x2]] }
  0xbf   : > { %v474_v8 = vmul.f32 %v473_v58, %v472_v1  ;;  %v556_v24 = vmul.f32 0.6931472, %v1191_v19  ;;  %v1193_v37 = vpop.eup %1192  ;;  %v755_v1 = vstv %s1040_s11  ;;  %s1781_s11 = sld [smem:[#allocation6 + $0x7]] }
  0xc0   : > { %v435_v11 = vadd.f32 %v434_v57, %v432_v5  ;;  %v516_v12 = vmul.f32 %v515_v2, %v514_v6  ;;  %v598_v39 = vmul.f32 0.6931472, %v1193_v37  ;;  %v720_v57 = vadd.f32 %v719_v50, %v718_v48  ;;  %v981_v37 = vld [vmem:[%s1693_s3 + $0x10] sm:$0xff] }
  0xc1   : > { %v477_v14 = vadd.f32 %v476_v61, %v474_v8  ;;  %v558_v29 = vmul.f32 %v557_v21, %v556_v24  ;;  %v644_v61 = vstv %s1747_s2  ;;  %v756_v3 = vsub.f32 %v1699_v15, %v755_v1  ;;  %s1779_s2 = sld [smem:[#allocation12 + $0x6]] }
  0xc2   : > { %v437_v16 = vmul.f32 1.442695, %v435_v11  ;;  %v519_v17 = vadd.f32 %v518_v9, %v516_v12  ;;  %v600_v43 = vmul.f32 %v599_v38, %v598_v39  ;;  %v722_v0 = vmax.f32 %v720_v57, 1e-30 }
  0xc3   : > { %v479_v20 = vmul.f32 1.442695, %v477_v14  ;;  %v561_v32 = vadd.f32 %v560_v26, %v558_v29  ;;  %v759_v6 = vsub.f32 %v1704_v22, %v758_v4  ;;  %v760_v7 = vmul.f32 %v756_v3, %v756_v3 }
  0xc4   : > { %1194 = vpow2.f32 %v437_v16  ;;  %v521_v23 = vmul.f32 1.442695, %v519_v17  ;;  %v603_v47 = vadd.f32 %v602_v41, %v600_v43  ;;  %v686_v17 = vstv %s1757_s17  ;;  %s1792_s17 = sld [smem:[#allocation2 + $0x3]] }
  0xc5   : > { %1196 = vpow2.f32 %v479_v20  ;;  %v563_v35 = vmul.f32 1.442695, %v561_v32  ;;  %v761_v10 = vmul.f32 %v759_v6, %v759_v6  ;;  %v484_v24 = vstv %s1767_s30  ;;  %v413_v32 = vld [vmem:[%s1693_s3] sm:$0xff]  ;;  %s1809_s3 = sld [smem:[#allocation12 + $0x9]] }
  0xc6   : > { %1198 = vpow2.f32 %v521_v23  ;;  %v605_v53 = vmul.f32 1.442695, %v603_v47  ;;  %v442_v23 = vstv %s1751_s16  ;;  %v452_v29 = vstv %s1762_s20  ;;  %s1800_s16 = sld [smem:[#allocation8 + $0x7]] }
  0xc7   : > { %1200 = vlog2.f32 %v638_v25  ;;  %v762_v22 = vadd.f32 %v761_v10, %v760_v7  ;;  %v494_v39 = vstv %s1771_s10  ;;  %v499_v48 = vstv %s1774_s19  ;;  %s1807_s20 = sld [smem:[#allocation8 + $0x8]] }
  0xc8   : > { %1202 = vpow2.f32 %v563_v35  ;;  %v725_v50 = vstv %s1781_s11  ;;  %v541_v1 = vstv %s1787_s22  ;;  %s1816_s30 = sld [smem:[#allocation2 + $0x4]] }
  0xc9   : > { %1204 = vlog2.f32 %v680_v40  ;;  %v764_v18 = vmax.f32 %v762_v22, 1e-30  ;;  %v526_v40 = vstv %s1776_s9  ;;  %s1825_s10 = sld [smem:[#allocation12 + $0xc]] }
  0xca   : > { %1206 = vpow2.f32 %v605_v53  ;;  %s1828_s19 = sld [smem:[#allocation12 + $0xd]] }
  0xcb   : > { %s1830_s9 = sld [smem:[#allocation2 + $0x5]] }
  0xcc   : > { %s1833_s11 = sld [smem:[#allocation12 + $0xf]] }
  0xcd   : > { %s1837_s22 = sld [smem:[#allocation12 + $0x11]] }
  0xd1   : > { %v1195_v49 = vpop.eup %1194 }
  0xd2   : > { %v1197_v51 = vpop.eup %1196  ;;  %v439_v52 = vsub.f32 0.0, %v1195_v49  ;;  %v531_v49 = vstv %s1779_s2  ;;  %s1015_s2 = sld [smem:[#allocation12 + $0xe]] }
  0xd3   : > { %v1199_v54 = vpop.eup %1198  ;;  %v481_v55 = vsub.f32 0.0, %v1197_v51 }
  0xd4   : > { %v1201_v58 = vpop.eup %1200  ;;  %v440_v59 = vmul.f32 1.442695, %v439_v52  ;;  %v523_v60 = vsub.f32 0.0, %v1199_v54 }
  0xd5   : > { %v482_v62 = vmul.f32 1.442695, %v481_v55  ;;  %v640_v63 = vmul.f32 0.6931472, %v1201_v58  ;;  %v1203_v8 = vpop.eup %1202 }
  0xd6   : > { %1208 = vpow2.f32 %v440_v59  ;;  %v524_v2 = vmul.f32 1.442695, %v523_v60  ;;  %v565_v15 = vsub.f32 0.0, %v1203_v8  ;;  %v1205_v11 = vpop.eup %1204 }
  0xd7   : > { %1210 = vpow2.f32 %v482_v62  ;;  %v642_v5 = vmul.f32 %v641_v56, %v640_v63  ;;  %v682_v16 = vmul.f32 0.6931472, %v1205_v11  ;;  %v1207_v21 = vpop.eup %1206 }
  0xd8   : > { %1212 = vpow2.f32 %v524_v2  ;;  %v566_v14 = vmul.f32 1.442695, %v565_v15  ;;  %v607_v25 = vsub.f32 0.0, %v1207_v21  ;;  %v568_v2 = vstv %s1792_s17  ;;  %s1842_s17 = sld [smem:[#allocation2 + $0x6]] }
  0xd9   : > { %v645_v9 = vadd.f32 %v644_v61, %v642_v5  ;;  %1214 = vlog2.f32 %v722_v0  ;;  %v684_v19 = vmul.f32 %v683_v13, %v682_v16  ;;  %v536_v0 = vstv %s1784_s12  ;;  %s1835_s12 = sld [smem:[#allocation12 + $0x10]] }
  0xda   : > { %v608_v41 = vmul.f32 1.442695, %v607_v25  ;;  %v728_v15 = vstv %s1800_s16  ;;  %s1845_s16 = sld [smem:[#allocation12 + $0x12]] }
  0xdb   : > { %v647_v12 = vmul.f32 1.442695, %v645_v9  ;;  %v687_v20 = vadd.f32 %v686_v17, %v684_v19  ;;  %v770_v19 = vstv %s1807_s20  ;;  %s1852_s20 = sld [smem:[#allocation12 + $0x14]] }
  0xdd   : > { %1216 = vpow2.f32 %v647_v12  ;;  %v689_v26 = vmul.f32 1.442695, %v687_v20 }
  0xde   : > { %1218 = vpow2.f32 %v566_v14  ;;  %v767_v14 = vstv %s1802_s23  ;;  %s1849_s23 = sld [smem:[#allocation12 + $0x13]] }
  0xdf   : > { %1220 = vlog2.f32 %v764_v18 }
  0xe0   : > { %1222 = vpow2.f32 %v689_v26 }
  0xe1   : > { %1224 = vpow2.f32 %v608_v41  ;;  %v583_v41 = vstv %s1819_s21  ;;  %s1860_s21 = sld [smem:[#allocation12 + $0x17]] }
  0xe3   : > { %v1209_v27 = vpop.eup %1208 }
  0xe4   : > { %v1211_v31 = vpop.eup %1210  ;;  %v443_v33 = vmul.f32 %v1209_v27, %v442_v23 }
  0xe5   : > { %v1213_v35 = vpop.eup %1212  ;;  %v485_v38 = vmul.f32 %v1211_v31, %v484_v24 }
  0xe6   : > { %v1215_v42 = vpop.eup %1214  ;;  %v444_v43 = vsub.f32 1.0, %v443_v33  ;;  %v448_v44 = vmul.f32 %v447_v28, %v443_v33  ;;  %v453_v45 = vmul.f32 %v452_v29, %v443_v33  ;;  %v458_v46 = vmul.f32 %v457_v30, %v443_v33 }
  0xe7   : > { %v486_v47 = vsub.f32 1.0, %v485_v38  ;;  %v527_v54 = vmul.f32 %v1213_v35, %v526_v40  ;;  %v490_v55 = vmul.f32 %v489_v34, %v485_v38  ;;  %v495_v56 = vmul.f32 %v494_v39, %v485_v38 }
  0xe8   : > { %v445_v51 = vmul.f32 %v444_v43, %v413_v32  ;;  %v450_v52 = vmul.f32 %v980_v36, %v444_v43  ;;  %v455_v53 = vmul.f32 %v981_v37, %v444_v43  ;;  %v724_v57 = vmul.f32 0.6931472, %v1215_v42 }
  0xe9   : > { %v500_v62 = vmul.f32 %v499_v48, %v485_v38  ;;  %v528_v8 = vsub.f32 1.0, %v527_v54  ;;  %v532_v16 = vmul.f32 %v531_v49, %v527_v54  ;;  %v537_v17 = vmul.f32 %v536_v0, %v527_v54 }
  0xea   : > { %v1217_v58 = vpop.eup %1216  ;;  %v449_v59 = vadd.f32 %v448_v44, %v445_v51  ;;  %v454_v60 = vadd.f32 %v453_v45, %v450_v52  ;;  %v459_v61 = vadd.f32 %v458_v46, %v455_v53  ;;  %v726_v10 = vmul.f32 %v725_v50, %v724_v57 }
  0xeb   : > { %v1219_v63 = vpop.eup %1218  ;;  %v649_v3 = vsub.f32 0.0, %v1217_v58  ;;  %v542_v26 = vmul.f32 %v541_v1, %v527_v54  ;;  %v573_v29 = vstv %s1809_s3  ;;  %v578_v30 = vstv %s1814_s18  ;;  %s1854_s3 = sld [smem:[#allocation2 + $0x7]] }
  0xec   : > { %v1221_v4 = vpop.eup %1220  ;;  %v487_v5 = vmul.f32 %v486_v47, %v449_v59  ;;  %v492_v6 = vmul.f32 %v486_v47, %v454_v60  ;;  %v497_v7 = vmul.f32 %v486_v47, %v459_v61  ;;  %v569_v18 = vmul.f32 %v1219_v63, %v568_v2  ;;  %s1856_s18 = sld [smem:[#allocation12 + $0x15]] }
  0xed   : > { %v650_v9 = vmul.f32 1.442695, %v649_v3  ;;  %v766_v11 = vmul.f32 0.6931472, %v1221_v4  ;;  %v729_v23 = vadd.f32 %v728_v15, %v726_v10  ;;  %v1223_v24 = vpop.eup %1222  ;;  %v610_v36 = vstv %s1816_s30  ;;  %s1858_s30 = sld [smem:[#allocation12 + $0x16]] }
  0xee   : > { %v491_v12 = vadd.f32 %v490_v55, %v487_v5  ;;  %v496_v13 = vadd.f32 %v495_v56, %v492_v6  ;;  %v501_v22 = vadd.f32 %v500_v62, %v497_v7  ;;  %v691_v28 = vsub.f32 0.0, %v1223_v24  ;;  %v1225_v40 = vpop.eup %1224 }
  0xef   : > { %1226 = vpow2.f32 %v650_v9  ;;  %v768_v27 = vmul.f32 %v767_v14, %v766_v11  ;;  %v731_v31 = vmul.f32 1.442695, %v729_v23  ;;  %v570_v35 = vsub.f32 1.0, %v569_v18 }
  0xf0   : > { %v529_v20 = vmul.f32 %v528_v8, %v491_v12  ;;  %v534_v21 = vmul.f32 %v528_v8, %v496_v13  ;;  %v539_v25 = vmul.f32 %v528_v8, %v501_v22  ;;  %v692_v38 = vmul.f32 1.442695, %v691_v28 }
  0xf1   : > { %v771_v32 = vadd.f32 %v770_v19, %v768_v27  ;;  %1228 = vpow2.f32 %v731_v31  ;;  %v574_v43 = vmul.f32 %v573_v29, %v569_v18  ;;  %v579_v44 = vmul.f32 %v578_v30, %v569_v18 }
  0xf2   : > { %v533_v33 = vadd.f32 %v532_v16, %v529_v20  ;;  %v538_v34 = vadd.f32 %v537_v17, %v534_v21  ;;  %v543_v37 = vadd.f32 %v542_v26, %v539_v25  ;;  %v611_v45 = vmul.f32 %v1225_v40, %v610_v36 }
  0xf3   : > { %v773_v39 = vmul.f32 1.442695, %v771_v32  ;;  %v584_v48 = vmul.f32 %v583_v41, %v569_v18  ;;  %v615_v54 = vstv %s1825_s10  ;;  %v652_v55 = vstv %s1830_s9  ;;  %s1864_s10 = sld [smem:[#allocation2 + $0x8]] }
  0xf4   : > { %v571_v42 = vmul.f32 %v570_v35, %v533_v33  ;;  %v576_v46 = vmul.f32 %v570_v35, %v538_v34  ;;  %v581_v47 = vmul.f32 %v570_v35, %v543_v37  ;;  %v612_v50 = vsub.f32 1.0, %v611_v45  ;;  %s1869_s9 = sld [smem:[#allocation12 + $0x19]] }
  0xf5   : > { %1230 = vpow2.f32 %v773_v39  ;;  %v620_v56 = vstv %s1828_s19  ;;  %v625_v57 = vstv %s1015_s2  ;;  %v616_v59 = vmul.f32 %v615_v54, %v611_v45  ;;  %s1866_s19 = sld [smem:[#allocation12 + $0x18]] }
  0xf6   : > { %1232 = vpow2.f32 %v692_v38  ;;  %v575_v49 = vadd.f32 %v574_v43, %v571_v42  ;;  %v580_v52 = vadd.f32 %v579_v44, %v576_v46  ;;  %v585_v53 = vadd.f32 %v584_v48, %v581_v47  ;;  %s1871_s2 = sld [smem:[#allocation12 + $0x1a]] }
  0xf7   : > { %v621_v62 = vmul.f32 %v620_v56, %v611_v45  ;;  %v626_v0 = vmul.f32 %v625_v57, %v611_v45  ;;  %v657_v2 = vstv %s1833_s11  ;;  %v662_v7 = vstv %s1835_s12  ;;  %s1056_s11 = smul.u32 384, %s1444_s27  ;;  %s390_s12 = scalar_lea.vmem [#allocation15], %s1055_s1 }
  0xf8   : > { %v613_v58 = vmul.f32 %v612_v50, %v575_v49  ;;  %v618_v61 = vmul.f32 %v612_v50, %v580_v52  ;;  %v623_v63 = vmul.f32 %v612_v50, %v585_v53  ;;  %v667_v8 = vstv %s1837_s22  ;;  %s816_s22 = sshll.u32 %s390_s12, 4  ;;  %s802_s27 = scalar_lea.sflag [#allocation4], %s1687_s0  ;;  %s1889_s22 = int_to_ptr.vmem [resolvable:$true] %s816_s22 }
  0xf9   : > { %v694_v13 = vstv %s1842_s17  ;;  %v699_v23 = vstv %s1845_s16  ;;  %v704_v24 = vstv %s1849_s23  ;;  %v709_v29 = vstv %s1852_s20  ;;  %s1887_s23 = scalar_lea.hbm %s1944_s7, %s1056_s11  ;;  %s1356_s1 = scalar_lea.vmem %s1889_s22, 384 }
  0xfa   : > { %v617_v5 = vadd.f32 %v616_v59, %v613_v58  ;;  %v622_v9 = vadd.f32 %v621_v62, %v618_v61  ;;  %v627_v10 = vadd.f32 %v626_v0, %v623_v63  ;;  %v736_v36 = vstv %s1854_s3  ;;  %p1357_p7 = scmp.ne.s32.totalorder %s1889_s22, %s1356_s1  ;;  %s1463_s20 = smov [#allocation15]  }
  0xfb   : > { %v741_v38 = vstv %s1856_s18  ;;  %v746_v39 = vstv %s1858_s30  ;;  %v751_v40 = vstv %s1860_s21  ;;  %v778_v41 = vstv %s1864_s10  ;;  %s1360_s3 = sshll.u32 %s1463_s20, 4  ;;  %s1361_s3 = int_to_ptr.vmem [resolvable:$false] %s1360_s3 }
  0xfc   : > { %v1227_v51 = vpop.eup %1226  ;;  %v783_v47 = vstv %s1866_s19  ;;  %v788_v48 = vstv %s1869_s9  ;;  %v793_v54 = vstv %s1871_s2  ;;  %p1358_p13 = pnand %p1357_p7, %p1641_p9  ;;  %s1362_s18 = scalar_lea.vmem %s1361_s3, 768 }
  0xfd   : > { %v653_v60 = vmul.f32 %v1227_v51, %v652_v55  ;;  %p1363_p0 = scmp.lt.s32.totalorder %s1889_s22, %s1361_s3  ;;  %p1364_p2 = scmp.lt.s32.totalorder %s1362_s18, %s1356_s1 }
  0xfe   : > { %v1229_v1 = vpop.eup %1228  ;;  %p1359_p8 = pneg %p1358_p13 }
  0xff   : > { %v733_v3 = vsub.f32 0.0, %v1229_v1  ;;  %v654_v6 = vsub.f32 1.0, %v653_v60  ;;  %v658_v16 = vmul.f32 %v657_v2, %v653_v60  ;;  %v663_v17 = vmul.f32 %v662_v7, %v653_v60  ;;  %p1365_p3 = por %p1364_p2, %p1363_p0 }
 0x100   : > { %v668_v18 = vmul.f32 %v667_v8, %v653_v60 }
 0x101   : > { %v734_v15 = vmul.f32 1.442695, %v733_v3  ;;  %v655_v14 = vmul.f32 %v654_v6, %v617_v5  ;;  %v660_v19 = vmul.f32 %v654_v6, %v622_v9  ;;  %v665_v20 = vmul.f32 %v654_v6, %v627_v10  ;;  %p1366_p6 = pnand %p1365_p3, %p1359_p8 }
 0x102   : > { %v1231_v4 = vpop.eup %1230 }
 0x103   : > { %v775_v11 = vsub.f32 0.0, %v1231_v4  ;;  %v1233_v12 = vpop.eup %1232  ;;  %1234 = vpow2.f32 %v734_v15  ;;  %v659_v25 = vadd.f32 %v658_v16, %v655_v14  ;;  %v664_v26 = vadd.f32 %v663_v17, %v660_v19 }
 0x104   : > { %v695_v21 = vmul.f32 %v1233_v12, %v694_v13  ;;  %v669_v27 = vadd.f32 %v668_v18, %v665_v20 }
 0x105   : > { %v776_v22 = vmul.f32 1.442695, %v775_v11 }
 0x106   : > { %v696_v28 = vsub.f32 1.0, %v695_v21  ;;  %v700_v30 = vmul.f32 %v699_v23, %v695_v21  ;;  %v705_v31 = vmul.f32 %v704_v24, %v695_v21  ;;  %v710_v35 = vmul.f32 %v709_v29, %v695_v21 }
 0x107   : > { %1236 = vpow2.f32 %v776_v22 }
 0x108   : > { %v697_v32 = vmul.f32 %v696_v28, %v659_v25  ;;  %v702_v33 = vmul.f32 %v696_v28, %v664_v26  ;;  %v707_v34 = vmul.f32 %v696_v28, %v669_v27 }
 0x10a   : > { %v701_v42 = vadd.f32 %v700_v30, %v697_v32  ;;  %v706_v43 = vadd.f32 %v705_v31, %v702_v33  ;;  %v711_v44 = vadd.f32 %v710_v35, %v707_v34 }
 0x110   : > { %v1235_v37 = vpop.eup %1234 }
 0x111   : > { %v737_v45 = vmul.f32 %v1235_v37, %v736_v36 }
 0x113   : > { %v738_v49 = vsub.f32 1.0, %v737_v45  ;;  %v742_v50 = vmul.f32 %v741_v38, %v737_v45  ;;  %v747_v51 = vmul.f32 %v746_v39, %v737_v45  ;;  %v752_v52 = vmul.f32 %v751_v40, %v737_v45 }
 0x114   : > { %v1237_v46 = vpop.eup %1236 }
 0x115   : > { %v779_v53 = vmul.f32 %v1237_v46, %v778_v41  ;;  %v739_v55 = vmul.f32 %v738_v49, %v701_v42  ;;  %v744_v56 = vmul.f32 %v738_v49, %v706_v43  ;;  %v749_v57 = vmul.f32 %v738_v49, %v711_v44 }
 0x117   : > { %v780_v58 = vsub.f32 1.0, %v779_v53  ;;  %v784_v59 = vmul.f32 %v783_v47, %v779_v53  ;;  %v789_v60 = vmul.f32 %v788_v48, %v779_v53  ;;  %v743_v61 = vadd.f32 %v742_v50, %v739_v55 }
 0x118   : > { %v748_v62 = vadd.f32 %v747_v51, %v744_v56  ;;  %v753_v63 = vadd.f32 %v752_v52, %v749_v57  ;;  %v794_v0 = vmul.f32 %v793_v54, %v779_v53 }
 0x119   : > { %v781_v1 = vmul.f32 %v780_v58, %v743_v61 }
 0x11a   : > { %v786_v2 = vmul.f32 %v780_v58, %v748_v62  ;;  %v791_v3 = vmul.f32 %v780_v58, %v753_v63 }
 0x11b   : > { %v785_v4 = vadd.f32 %v784_v59, %v781_v1 }
 0x11c   : > { %v790_v5 = vadd.f32 %v789_v60, %v786_v2  ;;  %v795_v6 = vadd.f32 %v794_v0, %v791_v3 }
 0x11d   : > { %796 = vst [vmem:[%s390_s12] sm:$0xff] %v785_v4 }
 0x11e   : > { %1048 = vst [vmem:[%s390_s12 + $0x8] sm:$0xff] %v790_v5  ;;  %1049 = vst [vmem:[%s390_s12 + $0x10] sm:$0xff] %v795_v6 }
 0x11f   : > { %1369 = shalt.err (!%p1366_p6)
}
 0x120   : > { %s1370_s30 = scalar_lea.hbm %s1887_s23, 384  ;;  %s1374_s19 = scalar_lea.hbm %s1944_s7, 768 }
 0x121   : > { %p1371_p1 = scmp.ne.s32.totalorder %s1887_s23, %s1370_s30  ;;  %p1375_p10 = scmp.lt.s32.totalorder %s1887_s23, %s1944_s7 }
 0x122   : > { %p1376_p12 = scmp.lt.s32.totalorder %s1374_s19, %s1370_s30 }
 0x123   : > { %p1372_p4 = pnand %p1371_p1, %p1641_p9 }
 0x124   : > { %p1377_p7 = por %p1376_p12, %p1375_p10 }
 0x125   : > { %p1373_p5 = pneg %p1372_p4 }
 0x127   : > { %p1378_p13 = pnand %p1377_p7, %p1373_p5 }
 0x129   : > { %1381 = shalt.err (!%p1378_p13)
}
 0x12a   : > { %s1464_s11 = smov 128   ;;  %s1465_s12 = smov 8  }
 0x12b   : > { %1083 = dma.vmem_to_hbm [thread:$0]  (%p1641_p9), %s1889_s22, 384, %s1887_s23, %s802_s27, %s1464_s11, %s1464_s11, %s1465_s12  }
 0x12c PF: > { %s831_s17 = sand.u32 1, %s1432_s24   ;;  %p1968_p8 = scmp.ge.s32.totalorder %s1452_s29, 2 }
 0x12d   : > { %s832_s16 = scalar_lea.sflag [#allocation4], %s831_s17 }
 0x12e   : > { %p1109_p0 = pnand %p1968_p8, %p1648_p11 }
 0x130   : > { %p1110_p2 = pneg %p1109_p0 }
 0x132   : > { %1427 = dma.done.wait (%p1110_p2), %s832_s16, 384  }
 0x133   : > { %1429 = vsyncadd (%p1110_p2), %s832_s16, 4294966912  ;;  %s27_s29 = sadd.s32 1, %s1452_s29   ;;  %s1969_s24 = smov %s1436_s25 }
 0x134   : > { %p24_p3 = scmp.ge.s32.totalorder %s27_s29, 4   ;;  %s1970_s25 = smov %s1440_s26 }
 0x135   : > { %s1971_s26 = smov %s1646_s13  ;;  %s1972_s27 = smov %s1448_s28 }
 0x136   : > { %s1973_s28 = smov %s1975_s15  ;;  %26 = sbr.rel (!%p24_p3) target bundleno = 15 (0xf), region = 122 }
 0x13b   :  { %837 = vsyncpa [#allocation3], 1 }
 0x13c   :  { %839 = vsyncpa [#allocation3 + $0x1], 1 }
 0x13d   :  { %840 = vsyncpa [#allocation4], 1 }
 0x13e   :  { %842 = vsyncpa [#allocation4 + $0x1], 1 }
 0x13f   :  { %843 = vsyncpa [#allocation5], 1 }
 0x140   :  { %845 = vsyncpa [#allocation5 + $0x1], 1 }
 0x141   :  { %846 = vsyncpa [#allocation7], 1 }
 0x142   :  { %847 = vsyncpa [#allocation10], 1 }
 0x143   :  { %848 = vsyncpa [#allocation13], 1 }

</bundles_post_ra>
